<compile_context>
chip_gen: v6e
topology: v6e:2x2x1
jax: 0.10.0
libtpu: 0.0.40
codegen_flags: <defaults>
</compile_context>

<pallas_src>
import functools

import jax
import jax.numpy as jnp
import numpy as np
from jax.experimental import pallas as pl
from jax.experimental.pallas import tpu as pltpu


def _make_divisible(v, divisor, min_value=None):
    if min_value is None:
        min_value = divisor
    new_v = max(min_value, int(v + divisor / 2) // divisor * divisor)
    if new_v < 0.9 * v:
        new_v += divisor
    return new_v


_HALO_H = 8  # sublane-aligned halo offset for the H dim of the padded scratch


# ----------------------------------------------------------------------------
# Fused MBConv kernel (one batch element per grid step).
# ----------------------------------------------------------------------------
def _mbconv_kernel(x_ref, we_ref, be_ref, a_ref, bdw_ref,
                   sw1_ref, sb1_ref, sw2_ref, sb2_ref, texp_ref,
                   wp_ref, bp_ref, o_ref, hpad_ref, *, D, H, W, C):
    WC = W * C
    x2 = x_ref[0]                                               # (D*H, W*Cin)

    # 1) expand 1x1x1 conv (BN1 scale folded into weights) + BN1 bias + SiLU
    h = jnp.dot(x2, we_ref[...], preferred_element_type=jnp.float32)
    h = h + be_ref[...]
    h = h * jax.nn.sigmoid(h)                                   # (D*H, W*C)

    # 2) in-kernel halo padding (d and h dims) into the VMEM scratch.
    #    Activations live at [1:1+D, _HALO_H:_HALO_H+H]; the rest stays zero.
    #    (Re-zero every step: cheap, and safe under megacore grid splitting.)
    hpad_ref[...] = jnp.zeros_like(hpad_ref)
    h3 = h.reshape(D, H, WC)
    for d in range(D):                                          # aligned slab stores
        hpad_ref[1 + d, _HALO_H:_HALO_H + H, :] = h3[d]

    # 3) depthwise 3x3x3 conv (BN2 scale + w-boundary zeros folded into the
    #    band matrices) + BN2 bias + SiLU
    acc = jnp.zeros((D * H, WC), jnp.float32)
    for kd in range(3):
        for kh in range(3):
            tap = hpad_ref[kd:kd + D, _HALO_H - 1 + kh:_HALO_H - 1 + kh + H, :]
            acc = acc + jnp.dot(tap.reshape(D * H, WC), a_ref[kd * 3 + kh],
                                preferred_element_type=jnp.float32)
    y = acc + bdw_ref[...]
    y = y * jax.nn.sigmoid(y)                                   # (D*H, W*C)

    # 4) SE: global average pool (1/(D*H*W) and the w-sum folded into fc1)
    #    followed by the 2-layer MLP, all on tiny (1, .) rows in VMEM.
    ysum = jnp.sum(y, axis=0, keepdims=True)                    # (1, W*C)
    e = jnp.dot(ysum, sw1_ref[...], preferred_element_type=jnp.float32)
    e = e + sb1_ref[...]
    e = e * jax.nn.sigmoid(e)                                   # SiLU, (1, R)
    e = jnp.dot(e, sw2_ref[...], preferred_element_type=jnp.float32)
    s = jax.nn.sigmoid(e + sb2_ref[...])                        # (1, C)
    # broadcast the per-channel SE gate to the packed (w, c) lane layout
    s_t = jnp.dot(s, texp_ref[...], preferred_element_type=jnp.float32)  # (1, W*C)

    # 5) SE scaling + 1x1x1 projection (BN3 folded) + BN3 bias + residual
    z = jnp.dot(y * s_t, wp_ref[...], preferred_element_type=jnp.float32)
    o_ref[0] = (z + bp_ref[...] + x2).astype(o_ref.dtype)


def mbconv_forward(x, packed):
    N, D, H, W, Cin = x.shape
    WCin = W * Cin
    WCh = packed["b_dw"].shape[1]
    hidden = WCh // W
    WCout = packed["b_p"].shape[1]
    Cout = WCout // W
    R = packed["se_b1"].shape[1]
    DH = D * H

    x2 = x.reshape(N, DH, WCin)           # lane-packed (w, c) layout
    kernel = functools.partial(_mbconv_kernel, D=D, H=H, W=W, C=hidden)
    const2 = lambda n: (0, 0)

    out = pl.pallas_call(
        kernel,
        grid=(N,),
        in_specs=[
            pl.BlockSpec((1, DH, WCin), lambda n: (n, 0, 0)),   # x (packed)
            pl.BlockSpec((WCin, WCh), const2),                  # expand weight
            pl.BlockSpec((1, WCh), const2),                     # BN1 bias (tiled)
            pl.BlockSpec((9, WCh, WCh), lambda n: (0, 0, 0)),   # depthwise band mats
            pl.BlockSpec((1, WCh), const2),                     # BN2 bias (tiled)
            pl.BlockSpec((WCh, R), const2),                     # SE fc1 (pool folded)
            pl.BlockSpec((1, R), const2),                       # SE fc1 bias
            pl.BlockSpec((R, hidden), const2),                  # SE fc2
            pl.BlockSpec((1, hidden), const2),                  # SE fc2 bias
            pl.BlockSpec((hidden, WCh), const2),                # channel->lane tiler
            pl.BlockSpec((WCh, WCout), const2),                 # projection weight
            pl.BlockSpec((1, WCout), const2),                   # BN3 bias (tiled)
        ],
        out_specs=pl.BlockSpec((1, DH, WCout), lambda n: (n, 0, 0)),
        out_shape=jax.ShapeDtypeStruct((N, DH, WCout), jnp.float32),
        scratch_shapes=[pltpu.VMEM((D + 2, H + 2 * _HALO_H, WCh), jnp.float32)],
        compiler_params=pltpu.CompilerParams(
            dimension_semantics=("parallel",)),
    )(x2, packed["w_e"], packed["b_e"], packed["a_dw"], packed["b_dw"],
      packed["se_w1"], packed["se_b1"], packed["se_w2"], packed["se_b2"],
      packed["t_exp"], packed["w_p"], packed["b_p"])
    return out.reshape(N, D, H, W, Cout)


# ----------------------------------------------------------------------------
# Host-side parameter packing: fold BN affine into the conv weights and build
# the lane-packed / block-diagonal / band matrices used by the kernel.
# ----------------------------------------------------------------------------
def pack_params(p, D, H, W, Cin, Cout, hidden):
    f32 = np.float32
    WCin, WCh, WCout = W * Cin, W * hidden, W * Cout

    w_e = np.asarray(p["w_expand"], f32)
    s1, b1 = np.asarray(p["bn1_scale"], f32), np.asarray(p["bn1_bias"], f32)
    w_dw = np.asarray(p["w_dw"], f32)
    s2, b2 = np.asarray(p["bn2_scale"], f32), np.asarray(p["bn2_bias"], f32)
    w_pr = np.asarray(p["w_proj"], f32)
    s3, b3 = np.asarray(p["bn3_scale"], f32), np.asarray(p["bn3_bias"], f32)

    # expand conv, BN1 scale folded, block-diagonal over w
    w_e_f = w_e * s1[None, :]
    w_e_big = np.zeros((WCin, WCh), f32)
    for w in range(W):
        w_e_big[w * Cin:(w + 1) * Cin, w * hidden:(w + 1) * hidden] = w_e_f
    b_e = np.tile(b1, W)[None, :]

    # depthwise conv: per-(kd, kh) band matrices over the packed (w, c) lanes.
    # A[kd*3+kh][w'*C + c, w*C + c] = w_dw[kd, kh, w'-w+1, c] * bn2_scale[c];
    # w' outside [0, W) is simply absent, which encodes the zero w-padding.
    w_dw_f = w_dw * s2[None, None, None, :]
    a_dw = np.zeros((9, WCh, WCh), f32)
    for kd in range(3):
        for kh in range(3):
            for kw in range(3):
                for w in range(W):
                    wp = w + kw - 1
                    if 0 <= wp < W:
                        a_dw[kd * 3 + kh,
                             wp * hidden:(wp + 1) * hidden,
                             w * hidden:(w + 1) * hidden] += np.diag(w_dw_f[kd, kh, kw])
    b_dw = np.tile(b2, W)[None, :]

    # SE: fold the global-average-pool scale (and the sum over w lanes) into fc1
    se_w1 = np.tile(np.asarray(p["se_w1"], f32), (W, 1)) / float(D * H * W)
    se_b1 = np.asarray(p["se_b1"], f32)[None, :]
    se_w2 = np.asarray(p["se_w2"], f32)
    se_b2 = np.asarray(p["se_b2"], f32)[None, :]
    # (C,) channel gate -> (W*C,) lane gate
    t_exp = np.tile(np.eye(hidden, dtype=f32), (1, W))

    # projection conv, BN3 scale folded, block-diagonal over w
    w_p_f = w_pr * s3[None, :]
    w_p_big = np.zeros((WCh, WCout), f32)
    for w in range(W):
        w_p_big[w * hidden:(w + 1) * hidden, w * Cout:(w + 1) * Cout] = w_p_f
    b_p = np.tile(b3, W)[None, :]

    to_j = lambda a: jnp.asarray(a, jnp.float32)
    return {
        "w_e": to_j(w_e_big), "b_e": to_j(b_e),
        "a_dw": to_j(a_dw), "b_dw": to_j(b_dw),
        "se_w1": to_j(se_w1), "se_b1": to_j(se_b1),
        "se_w2": to_j(se_w2), "se_b2": to_j(se_b2),
        "t_exp": to_j(t_exp),
        "w_p": to_j(w_p_big), "b_p": to_j(b_p),
    }


# ----------------------------------------------------------------------------
# Deterministic parameter construction (folded BN) and pure-JAX reference.
# ----------------------------------------------------------------------------
def _fold_bn(key, c, eps=1e-5):
    k1, k2, k3, k4 = jax.random.split(key, 4)
    gamma = 1.0 + 0.1 * jax.random.normal(k1, (c,), jnp.float32)
    beta = 0.1 * jax.random.normal(k2, (c,), jnp.float32)
    mean = 0.1 * jax.random.normal(k3, (c,), jnp.float32)
    var = 1.0 + 0.1 * jnp.abs(jax.random.normal(k4, (c,), jnp.float32))
    scale = gamma / jnp.sqrt(var + eps)
    bias = beta - mean * scale
    return scale, bias


def init_params(key, cin, cout, hidden, se_dim):
    ks = jax.random.split(key, 10)
    p = {}
    p["w_expand"] = 0.2 * jax.random.normal(ks[0], (cin, hidden), jnp.float32)
    p["bn1_scale"], p["bn1_bias"] = _fold_bn(ks[1], hidden)
    p["w_dw"] = 0.2 * jax.random.normal(ks[2], (3, 3, 3, hidden), jnp.float32)
    p["bn2_scale"], p["bn2_bias"] = _fold_bn(ks[3], hidden)
    p["se_w1"] = 0.2 * jax.random.normal(ks[4], (hidden, se_dim), jnp.float32)
    p["se_b1"] = 0.1 * jax.random.normal(ks[5], (se_dim,), jnp.float32)
    p["se_w2"] = 0.2 * jax.random.normal(ks[6], (se_dim, hidden), jnp.float32)
    p["se_b2"] = 0.1 * jax.random.normal(ks[7], (hidden,), jnp.float32)
    p["w_proj"] = 0.2 * jax.random.normal(ks[8], (hidden, cout), jnp.float32)
    p["bn3_scale"], p["bn3_bias"] = _fold_bn(ks[9], cout)
    return p


def reference(x, p):
    N, D, H, W, _ = x.shape
    h = jnp.einsum("ndhwc,ck->ndhwk", x, p["w_expand"])
    h = h * p["bn1_scale"] + p["bn1_bias"]
    h = h * jax.nn.sigmoid(h)
    hp = jnp.pad(h, ((0, 0), (1, 1), (1, 1), (1, 1), (0, 0)))
    acc = jnp.zeros_like(h)
    for kd in range(3):
        for kh in range(3):
            for kw in range(3):
                acc = acc + hp[:, kd:kd + D, kh:kh + H, kw:kw + W, :] * p["w_dw"][kd, kh, kw]
    y = acc * p["bn2_scale"] + p["bn2_bias"]
    y = y * jax.nn.sigmoid(y)
    pooled = jnp.mean(y, axis=(1, 2, 3))
    s = pooled @ p["se_w1"] + p["se_b1"]
    s = s * jax.nn.sigmoid(s)
    s = jax.nn.sigmoid(s @ p["se_w2"] + p["se_b2"])
    ys = y * s[:, None, None, None, :]
    z = jnp.einsum("ndhwc,ck->ndhwk", ys, p["w_proj"])
    z = z * p["bn3_scale"] + p["bn3_bias"]
    return x + z


if __name__ == "__main__":
    N, Cin, Cout, D, H, W = 2, 8, 8, 4, 8, 8
    stride, expand_ratio, use_se = 1, 2, True
    assert stride == 1 and Cin == Cout and use_se   # identity path, SE branch
    hidden = round(Cin * expand_ratio)              # 16 -> W*hidden = 128 lanes
    se_dim = _make_divisible(Cin // 4, 8)           # 8

    root = jax.random.PRNGKey(0)
    k_params, k_x = jax.random.split(root)
    params = init_params(k_params, Cin, Cout, hidden, se_dim)
    packed = pack_params(params, D, H, W, Cin, Cout, hidden)
    x = jax.random.normal(k_x, (N, D, H, W, Cin), jnp.float32)

    out = jax.block_until_ready(mbconv_forward(x, packed))
    ref = reference(x, params)

    assert out.shape == (N, D, H, W, Cout)
    # Tolerance accounts for the kernel running the depthwise taps as MXU
    # matmuls (default matmul precision) vs. exact-f32 VPU adds in the
    # pure-JAX reference; real packing/logic bugs produce O(0.1-1) errors.
    assert jnp.allclose(out, ref, atol=1e-2, rtol=1e-2), float(jnp.max(jnp.abs(out - ref)))
    print("KERNEL_OK")
</pallas_src>

<mosaic_0001>
module attributes {stable_mosaic.version = 11 : i64} {
  func.func @_mbconv_kernel(%arg0: i32, %arg1: memref<1x32x64xf32, #tpu.memory_space<vmem>>, %arg2: memref<64x128xf32, #tpu.memory_space<vmem>>, %arg3: memref<1x128xf32, #tpu.memory_space<vmem>>, %arg4: memref<9x128x128xf32, #tpu.memory_space<vmem>>, %arg5: memref<1x128xf32, #tpu.memory_space<vmem>>, %arg6: memref<128x8xf32, #tpu.memory_space<vmem>>, %arg7: memref<1x8xf32, #tpu.memory_space<vmem>>, %arg8: memref<8x16xf32, #tpu.memory_space<vmem>>, %arg9: memref<1x16xf32, #tpu.memory_space<vmem>>, %arg10: memref<16x128xf32, #tpu.memory_space<vmem>>, %arg11: memref<128x64xf32, #tpu.memory_space<vmem>>, %arg12: memref<1x64xf32, #tpu.memory_space<vmem>>, %arg13: memref<1x32x64xf32, #tpu.memory_space<vmem>>, %arg14: memref<6x24x128xf32, #tpu.memory_space<vmem>>) attributes {dimension_semantics = [#tpu.dimension_semantics<parallel>], iteration_bounds = array<i64: 2>, scalar_prefetch = 0 : i64, scratch_operands = 1 : i64, tpu.core_type = #tpu.core_type<tc>, window_params = [{transform_indices = @transform_0, window_bounds = array<i64: 1, 32, 64>}, {pipeline_mode = #tpu.pipeline_mode<synchronous>, transform_indices = @transform_1, window_bounds = array<i64: 64, 128>}, {pipeline_mode = #tpu.pipeline_mode<synchronous>, transform_indices = @transform_2, window_bounds = array<i64: 1, 128>}, {pipeline_mode = #tpu.pipeline_mode<synchronous>, transform_indices = @transform_3, window_bounds = array<i64: 9, 128, 128>}, {pipeline_mode = #tpu.pipeline_mode<synchronous>, transform_indices = @transform_4, window_bounds = array<i64: 1, 128>}, {pipeline_mode = #tpu.pipeline_mode<synchronous>, transform_indices = @transform_5, window_bounds = array<i64: 128, 8>}, {pipeline_mode = #tpu.pipeline_mode<synchronous>, transform_indices = @transform_6, window_bounds = array<i64: 1, 8>}, {pipeline_mode = #tpu.pipeline_mode<synchronous>, transform_indices = @transform_7, window_bounds = array<i64: 8, 16>}, {pipeline_mode = #tpu.pipeline_mode<synchronous>, transform_indices = @transform_8, window_bounds = array<i64: 1, 16>}, {pipeline_mode = #tpu.pipeline_mode<synchronous>, transform_indices = @transform_9, window_bounds = array<i64: 16, 128>}, {pipeline_mode = #tpu.pipeline_mode<synchronous>, transform_indices = @transform_10, window_bounds = array<i64: 128, 64>}, {pipeline_mode = #tpu.pipeline_mode<synchronous>, transform_indices = @transform_11, window_bounds = array<i64: 1, 64>}, {transform_indices = @transform_12, window_bounds = array<i64: 1, 32, 64>}]} {
    %c0 = arith.constant 0 : index
    %c0_0 = arith.constant 0 : index
    %c0_1 = arith.constant 0 : index
    %0 = vector.load %arg1[%c0, %c0_0, %c0_1] : memref<1x32x64xf32, #tpu.memory_space<vmem>>, vector<1x32x64xf32>
    %1 = vector.shape_cast %0 : vector<1x32x64xf32> to vector<32x64xf32>
    %c0_2 = arith.constant 0 : index
    %c0_3 = arith.constant 0 : index
    %2 = vector.load %arg2[%c0_2, %c0_3] : memref<64x128xf32, #tpu.memory_space<vmem>>, vector<64x128xf32>
    %cst = arith.constant dense<0.000000e+00> : vector<32x128xf32>
    %3 = tpu.matmul %1, %2, %cst {dimension_numbers = #tpu.dot_dimension_numbers<[1], [0], [0], [1], [0, 0, 1, 1], [], []>} : vector<32x64xf32>, vector<64x128xf32>, vector<32x128xf32> -> vector<32x128xf32>
    %c0_4 = arith.constant 0 : index
    %c0_5 = arith.constant 0 : index
    %4 = vector.load %arg3[%c0_4, %c0_5] : memref<1x128xf32, #tpu.memory_space<vmem>>, vector<1x128xf32>
    %5 = vector.broadcast %4 : vector<1x128xf32> to vector<32x128xf32>
    %6 = arith.addf %3, %5 : vector<32x128xf32>
    %7 = arith.negf %6 : vector<32x128xf32>
    %8 = math.exp %7 : vector<32x128xf32>
    %cst_6 = arith.constant 1.000000e+00 : f32
    %9 = vector.broadcast %cst_6 : f32 to vector<32x128xf32>
    %10 = arith.addf %9, %8 : vector<32x128xf32>
    %11 = arith.divf %9, %10 : vector<32x128xf32>
    %12 = arith.mulf %6, %11 : vector<32x128xf32>
    %cst_7 = arith.constant 0.000000e+00 : f32
    %13 = vector.broadcast %cst_7 : f32 to vector<6x24x128xf32>
    %c0_8 = arith.constant 0 : index
    %c0_9 = arith.constant 0 : index
    %c0_10 = arith.constant 0 : index
    %14 = vector.load %arg14[%c0_8, %c0_9, %c0_10] : memref<6x24x128xf32, #tpu.memory_space<vmem>>, vector<6x24x128xf32>
    tpu.vector_store %arg14[%c0_8, %c0_9, %c0_10], %13 {strides = array<i32>} : memref<6x24x128xf32, #tpu.memory_space<vmem>>, vector<6x24x128xf32>,
    %15 = vector.shape_cast %12 : vector<32x128xf32> to vector<4x8x128xf32>
    %16 = vector.extract_strided_slice %15 {offsets = [0, 0, 0], sizes = [1, 8, 128], strides = [1, 1, 1]} : vector<4x8x128xf32> to vector<1x8x128xf32>
    %17 = vector.shape_cast %16 : vector<1x8x128xf32> to vector<8x128xf32>
    %c1 = arith.constant 1 : index
    %c8 = arith.constant 8 : index
    %c0_11 = arith.constant 0 : index
    %18 = vector.load %arg14[%c1, %c8, %c0_11] : memref<6x24x128xf32, #tpu.memory_space<vmem>>, vector<1x8x128xf32>
    %19 = vector.shape_cast %18 : vector<1x8x128xf32> to vector<8x128xf32>
    %20 = vector.shape_cast %17 : vector<8x128xf32> to vector<1x8x128xf32>
    tpu.vector_store %arg14[%c1, %c8, %c0_11], %20 {strides = array<i32>} : memref<6x24x128xf32, #tpu.memory_space<vmem>>, vector<1x8x128xf32>,
    %21 = vector.extract_strided_slice %15 {offsets = [1, 0, 0], sizes = [1, 8, 128], strides = [1, 1, 1]} : vector<4x8x128xf32> to vector<1x8x128xf32>
    %22 = vector.shape_cast %21 : vector<1x8x128xf32> to vector<8x128xf32>
    %c2 = arith.constant 2 : index
    %c8_12 = arith.constant 8 : index
    %c0_13 = arith.constant 0 : index
    %23 = vector.load %arg14[%c2, %c8_12, %c0_13] : memref<6x24x128xf32, #tpu.memory_space<vmem>>, vector<1x8x128xf32>
    %24 = vector.shape_cast %23 : vector<1x8x128xf32> to vector<8x128xf32>
    %25 = vector.shape_cast %22 : vector<8x128xf32> to vector<1x8x128xf32>
    tpu.vector_store %arg14[%c2, %c8_12, %c0_13], %25 {strides = array<i32>} : memref<6x24x128xf32, #tpu.memory_space<vmem>>, vector<1x8x128xf32>,
    %26 = vector.extract_strided_slice %15 {offsets = [2, 0, 0], sizes = [1, 8, 128], strides = [1, 1, 1]} : vector<4x8x128xf32> to vector<1x8x128xf32>
    %27 = vector.shape_cast %26 : vector<1x8x128xf32> to vector<8x128xf32>
    %c3 = arith.constant 3 : index
    %c8_14 = arith.constant 8 : index
    %c0_15 = arith.constant 0 : index
    %28 = vector.load %arg14[%c3, %c8_14, %c0_15] : memref<6x24x128xf32, #tpu.memory_space<vmem>>, vector<1x8x128xf32>
    %29 = vector.shape_cast %28 : vector<1x8x128xf32> to vector<8x128xf32>
    %30 = vector.shape_cast %27 : vector<8x128xf32> to vector<1x8x128xf32>
    tpu.vector_store %arg14[%c3, %c8_14, %c0_15], %30 {strides = array<i32>} : memref<6x24x128xf32, #tpu.memory_space<vmem>>, vector<1x8x128xf32>,
    %31 = vector.extract_strided_slice %15 {offsets = [3, 0, 0], sizes = [1, 8, 128], strides = [1, 1, 1]} : vector<4x8x128xf32> to vector<1x8x128xf32>
    %32 = vector.shape_cast %31 : vector<1x8x128xf32> to vector<8x128xf32>
    %c4 = arith.constant 4 : index
    %c8_16 = arith.constant 8 : index
    %c0_17 = arith.constant 0 : index
    %33 = vector.load %arg14[%c4, %c8_16, %c0_17] : memref<6x24x128xf32, #tpu.memory_space<vmem>>, vector<1x8x128xf32>
    %34 = vector.shape_cast %33 : vector<1x8x128xf32> to vector<8x128xf32>
    %35 = vector.shape_cast %32 : vector<8x128xf32> to vector<1x8x128xf32>
    tpu.vector_store %arg14[%c4, %c8_16, %c0_17], %35 {strides = array<i32>} : memref<6x24x128xf32, #tpu.memory_space<vmem>>, vector<1x8x128xf32>,
    %cst_18 = arith.constant 0.000000e+00 : f32
    %36 = vector.broadcast %cst_18 : f32 to vector<32x128xf32>
    %c0_19 = arith.constant 0 : index
    %c7 = arith.constant 7 : index
    %c0_20 = arith.constant 0 : index
    %37 = vector.load %arg14[%c0_19, %c7, %c0_20] : memref<6x24x128xf32, #tpu.memory_space<vmem>>, vector<4x8x128xf32>
    %38 = vector.shape_cast %37 : vector<4x8x128xf32> to vector<32x128xf32>
    %c0_21 = arith.constant 0 : index
    %c0_22 = arith.constant 0 : index
    %c0_23 = arith.constant 0 : index
    %39 = vector.load %arg4[%c0_21, %c0_22, %c0_23] : memref<9x128x128xf32, #tpu.memory_space<vmem>>, vector<1x128x128xf32>
    %40 = vector.shape_cast %39 : vector<1x128x128xf32> to vector<128x128xf32>
    %cst_24 = arith.constant dense<0.000000e+00> : vector<32x128xf32>
    %41 = tpu.matmul %38, %40, %cst_24 {dimension_numbers = #tpu.dot_dimension_numbers<[1], [0], [0], [1], [0, 0, 1, 1], [], []>} : vector<32x128xf32>, vector<128x128xf32>, vector<32x128xf32> -> vector<32x128xf32>
    %42 = arith.addf %36, %41 : vector<32x128xf32>
    %c0_25 = arith.constant 0 : index
    %c8_26 = arith.constant 8 : index
    %c0_27 = arith.constant 0 : index
    %43 = vector.load %arg14[%c0_25, %c8_26, %c0_27] : memref<6x24x128xf32, #tpu.memory_space<vmem>>, vector<4x8x128xf32>
    %44 = vector.shape_cast %43 : vector<4x8x128xf32> to vector<32x128xf32>
    %c1_28 = arith.constant 1 : index
    %c0_29 = arith.constant 0 : index
    %c0_30 = arith.constant 0 : index
    %45 = vector.load %arg4[%c1_28, %c0_29, %c0_30] : memref<9x128x128xf32, #tpu.memory_space<vmem>>, vector<1x128x128xf32>
    %46 = vector.shape_cast %45 : vector<1x128x128xf32> to vector<128x128xf32>
    %cst_31 = arith.constant dense<0.000000e+00> : vector<32x128xf32>
    %47 = tpu.matmul %44, %46, %cst_31 {dimension_numbers = #tpu.dot_dimension_numbers<[1], [0], [0], [1], [0, 0, 1, 1], [], []>} : vector<32x128xf32>, vector<128x128xf32>, vector<32x128xf32> -> vector<32x128xf32>
    %48 = arith.addf %42, %47 : vector<32x128xf32>
    %c0_32 = arith.constant 0 : index
    %c9 = arith.constant 9 : index
    %c0_33 = arith.constant 0 : index
    %49 = vector.load %arg14[%c0_32, %c9, %c0_33] : memref<6x24x128xf32, #tpu.memory_space<vmem>>, vector<4x8x128xf32>
    %50 = vector.shape_cast %49 : vector<4x8x128xf32> to vector<32x128xf32>
    %c2_34 = arith.constant 2 : index
    %c0_35 = arith.constant 0 : index
    %c0_36 = arith.constant 0 : index
    %51 = vector.load %arg4[%c2_34, %c0_35, %c0_36] : memref<9x128x128xf32, #tpu.memory_space<vmem>>, vector<1x128x128xf32>
    %52 = vector.shape_cast %51 : vector<1x128x128xf32> to vector<128x128xf32>
    %cst_37 = arith.constant dense<0.000000e+00> : vector<32x128xf32>
    %53 = tpu.matmul %50, %52, %cst_37 {dimension_numbers = #tpu.dot_dimension_numbers<[1], [0], [0], [1], [0, 0, 1, 1], [], []>} : vector<32x128xf32>, vector<128x128xf32>, vector<32x128xf32> -> vector<32x128xf32>
    %54 = arith.addf %48, %53 : vector<32x128xf32>
    %c1_38 = arith.constant 1 : index
    %c7_39 = arith.constant 7 : index
    %c0_40 = arith.constant 0 : index
    %55 = vector.load %arg14[%c1_38, %c7_39, %c0_40] : memref<6x24x128xf32, #tpu.memory_space<vmem>>, vector<4x8x128xf32>
    %56 = vector.shape_cast %55 : vector<4x8x128xf32> to vector<32x128xf32>
    %c3_41 = arith.constant 3 : index
    %c0_42 = arith.constant 0 : index
    %c0_43 = arith.constant 0 : index
    %57 = vector.load %arg4[%c3_41, %c0_42, %c0_43] : memref<9x128x128xf32, #tpu.memory_space<vmem>>, vector<1x128x128xf32>
    %58 = vector.shape_cast %57 : vector<1x128x128xf32> to vector<128x128xf32>
    %cst_44 = arith.constant dense<0.000000e+00> : vector<32x128xf32>
    %59 = tpu.matmul %56, %58, %cst_44 {dimension_numbers = #tpu.dot_dimension_numbers<[1], [0], [0], [1], [0, 0, 1, 1], [], []>} : vector<32x128xf32>, vector<128x128xf32>, vector<32x128xf32> -> vector<32x128xf32>
    %60 = arith.addf %54, %59 : vector<32x128xf32>
    %c1_45 = arith.constant 1 : index
    %c8_46 = arith.constant 8 : index
    %c0_47 = arith.constant 0 : index
    %61 = vector.load %arg14[%c1_45, %c8_46, %c0_47] : memref<6x24x128xf32, #tpu.memory_space<vmem>>, vector<4x8x128xf32>
    %62 = vector.shape_cast %61 : vector<4x8x128xf32> to vector<32x128xf32>
    %c4_48 = arith.constant 4 : index
    %c0_49 = arith.constant 0 : index
    %c0_50 = arith.constant 0 : index
    %63 = vector.load %arg4[%c4_48, %c0_49, %c0_50] : memref<9x128x128xf32, #tpu.memory_space<vmem>>, vector<1x128x128xf32>
    %64 = vector.shape_cast %63 : vector<1x128x128xf32> to vector<128x128xf32>
    %cst_51 = arith.constant dense<0.000000e+00> : vector<32x128xf32>
    %65 = tpu.matmul %62, %64, %cst_51 {dimension_numbers = #tpu.dot_dimension_numbers<[1], [0], [0], [1], [0, 0, 1, 1], [], []>} : vector<32x128xf32>, vector<128x128xf32>, vector<32x128xf32> -> vector<32x128xf32>
    %66 = arith.addf %60, %65 : vector<32x128xf32>
    %c1_52 = arith.constant 1 : index
    %c9_53 = arith.constant 9 : index
    %c0_54 = arith.constant 0 : index
    %67 = vector.load %arg14[%c1_52, %c9_53, %c0_54] : memref<6x24x128xf32, #tpu.memory_space<vmem>>, vector<4x8x128xf32>
    %68 = vector.shape_cast %67 : vector<4x8x128xf32> to vector<32x128xf32>
    %c5 = arith.constant 5 : index
    %c0_55 = arith.constant 0 : index
    %c0_56 = arith.constant 0 : index
    %69 = vector.load %arg4[%c5, %c0_55, %c0_56] : memref<9x128x128xf32, #tpu.memory_space<vmem>>, vector<1x128x128xf32>
    %70 = vector.shape_cast %69 : vector<1x128x128xf32> to vector<128x128xf32>
    %cst_57 = arith.constant dense<0.000000e+00> : vector<32x128xf32>
    %71 = tpu.matmul %68, %70, %cst_57 {dimension_numbers = #tpu.dot_dimension_numbers<[1], [0], [0], [1], [0, 0, 1, 1], [], []>} : vector<32x128xf32>, vector<128x128xf32>, vector<32x128xf32> -> vector<32x128xf32>
    %72 = arith.addf %66, %71 : vector<32x128xf32>
    %c2_58 = arith.constant 2 : index
    %c7_59 = arith.constant 7 : index
    %c0_60 = arith.constant 0 : index
    %73 = vector.load %arg14[%c2_58, %c7_59, %c0_60] : memref<6x24x128xf32, #tpu.memory_space<vmem>>, vector<4x8x128xf32>
    %74 = vector.shape_cast %73 : vector<4x8x128xf32> to vector<32x128xf32>
    %c6 = arith.constant 6 : index
    %c0_61 = arith.constant 0 : index
    %c0_62 = arith.constant 0 : index
    %75 = vector.load %arg4[%c6, %c0_61, %c0_62] : memref<9x128x128xf32, #tpu.memory_space<vmem>>, vector<1x128x128xf32>
    %76 = vector.shape_cast %75 : vector<1x128x128xf32> to vector<128x128xf32>
    %cst_63 = arith.constant dense<0.000000e+00> : vector<32x128xf32>
    %77 = tpu.matmul %74, %76, %cst_63 {dimension_numbers = #tpu.dot_dimension_numbers<[1], [0], [0], [1], [0, 0, 1, 1], [], []>} : vector<32x128xf32>, vector<128x128xf32>, vector<32x128xf32> -> vector<32x128xf32>
    %78 = arith.addf %72, %77 : vector<32x128xf32>
    %c2_64 = arith.constant 2 : index
    %c8_65 = arith.constant 8 : index
    %c0_66 = arith.constant 0 : index
    %79 = vector.load %arg14[%c2_64, %c8_65, %c0_66] : memref<6x24x128xf32, #tpu.memory_space<vmem>>, vector<4x8x128xf32>
    %80 = vector.shape_cast %79 : vector<4x8x128xf32> to vector<32x128xf32>
    %c7_67 = arith.constant 7 : index
    %c0_68 = arith.constant 0 : index
    %c0_69 = arith.constant 0 : index
    %81 = vector.load %arg4[%c7_67, %c0_68, %c0_69] : memref<9x128x128xf32, #tpu.memory_space<vmem>>, vector<1x128x128xf32>
    %82 = vector.shape_cast %81 : vector<1x128x128xf32> to vector<128x128xf32>
    %cst_70 = arith.constant dense<0.000000e+00> : vector<32x128xf32>
    %83 = tpu.matmul %80, %82, %cst_70 {dimension_numbers = #tpu.dot_dimension_numbers<[1], [0], [0], [1], [0, 0, 1, 1], [], []>} : vector<32x128xf32>, vector<128x128xf32>, vector<32x128xf32> -> vector<32x128xf32>
    %84 = arith.addf %78, %83 : vector<32x128xf32>
    %c2_71 = arith.constant 2 : index
    %c9_72 = arith.constant 9 : index
    %c0_73 = arith.constant 0 : index
    %85 = vector.load %arg14[%c2_71, %c9_72, %c0_73] : memref<6x24x128xf32, #tpu.memory_space<vmem>>, vector<4x8x128xf32>
    %86 = vector.shape_cast %85 : vector<4x8x128xf32> to vector<32x128xf32>
    %c8_74 = arith.constant 8 : index
    %c0_75 = arith.constant 0 : index
    %c0_76 = arith.constant 0 : index
    %87 = vector.load %arg4[%c8_74, %c0_75, %c0_76] : memref<9x128x128xf32, #tpu.memory_space<vmem>>, vector<1x128x128xf32>
    %88 = vector.shape_cast %87 : vector<1x128x128xf32> to vector<128x128xf32>
    %cst_77 = arith.constant dense<0.000000e+00> : vector<32x128xf32>
    %89 = tpu.matmul %86, %88, %cst_77 {dimension_numbers = #tpu.dot_dimension_numbers<[1], [0], [0], [1], [0, 0, 1, 1], [], []>} : vector<32x128xf32>, vector<128x128xf32>, vector<32x128xf32> -> vector<32x128xf32>
    %90 = arith.addf %84, %89 : vector<32x128xf32>
    %c0_78 = arith.constant 0 : index
    %c0_79 = arith.constant 0 : index
    %91 = vector.load %arg5[%c0_78, %c0_79] : memref<1x128xf32, #tpu.memory_space<vmem>>, vector<1x128xf32>
    %92 = vector.broadcast %91 : vector<1x128xf32> to vector<32x128xf32>
    %93 = arith.addf %90, %92 : vector<32x128xf32>
    %94 = arith.negf %93 : vector<32x128xf32>
    %95 = math.exp %94 : vector<32x128xf32>
    %cst_80 = arith.constant 1.000000e+00 : f32
    %96 = vector.broadcast %cst_80 : f32 to vector<32x128xf32>
    %97 = arith.addf %96, %95 : vector<32x128xf32>
    %98 = arith.divf %96, %97 : vector<32x128xf32>
    %99 = arith.mulf %93, %98 : vector<32x128xf32>
    %cst_81 = arith.constant dense<0.000000e+00> : vector<128xf32>
    %100 = vector.multi_reduction <add>, %99, %cst_81 [0] : vector<32x128xf32> to vector<128xf32>
    %101 = vector.shape_cast %100 : vector<128xf32> to vector<1x128xf32>
    %c0_82 = arith.constant 0 : index
    %c0_83 = arith.constant 0 : index
    %102 = vector.load %arg6[%c0_82, %c0_83] : memref<128x8xf32, #tpu.memory_space<vmem>>, vector<128x8xf32>
    %cst_84 = arith.constant dense<0.000000e+00> : vector<1x8xf32>
    %103 = tpu.matmul %101, %102, %cst_84 {dimension_numbers = #tpu.dot_dimension_numbers<[1], [0], [0], [1], [0, 0, 1, 1], [], []>} : vector<1x128xf32>, vector<128x8xf32>, vector<1x8xf32> -> vector<1x8xf32>
    %c0_85 = arith.constant 0 : index
    %c0_86 = arith.constant 0 : index
    %104 = vector.load %arg7[%c0_85, %c0_86] : memref<1x8xf32, #tpu.memory_space<vmem>>, vector<1x8xf32>
    %105 = arith.addf %103, %104 : vector<1x8xf32>
    %106 = arith.negf %105 : vector<1x8xf32>
    %107 = math.exp %106 : vector<1x8xf32>
    %cst_87 = arith.constant 1.000000e+00 : f32
    %108 = vector.broadcast %cst_87 : f32 to vector<1x8xf32>
    %109 = arith.addf %108, %107 : vector<1x8xf32>
    %110 = arith.divf %108, %109 : vector<1x8xf32>
    %111 = arith.mulf %105, %110 : vector<1x8xf32>
    %c0_88 = arith.constant 0 : index
    %c0_89 = arith.constant 0 : index
    %112 = vector.load %arg8[%c0_88, %c0_89] : memref<8x16xf32, #tpu.memory_space<vmem>>, vector<8x16xf32>
    %cst_90 = arith.constant dense<0.000000e+00> : vector<1x16xf32>
    %113 = tpu.matmul %111, %112, %cst_90 {dimension_numbers = #tpu.dot_dimension_numbers<[1], [0], [0], [1], [0, 0, 1, 1], [], []>} : vector<1x8xf32>, vector<8x16xf32>, vector<1x16xf32> -> vector<1x16xf32>
    %c0_91 = arith.constant 0 : index
    %c0_92 = arith.constant 0 : index
    %114 = vector.load %arg9[%c0_91, %c0_92] : memref<1x16xf32, #tpu.memory_space<vmem>>, vector<1x16xf32>
    %115 = arith.addf %113, %114 : vector<1x16xf32>
    %116 = arith.negf %115 : vector<1x16xf32>
    %117 = math.exp %116 : vector<1x16xf32>
    %cst_93 = arith.constant 1.000000e+00 : f32
    %118 = vector.broadcast %cst_93 : f32 to vector<1x16xf32>
    %119 = arith.addf %118, %117 : vector<1x16xf32>
    %120 = arith.divf %118, %119 : vector<1x16xf32>
    %c0_94 = arith.constant 0 : index
    %c0_95 = arith.constant 0 : index
    %121 = vector.load %arg10[%c0_94, %c0_95] : memref<16x128xf32, #tpu.memory_space<vmem>>, vector<16x128xf32>
    %cst_96 = arith.constant dense<0.000000e+00> : vector<1x128xf32>
    %122 = tpu.matmul %120, %121, %cst_96 {dimension_numbers = #tpu.dot_dimension_numbers<[1], [0], [0], [1], [0, 0, 1, 1], [], []>} : vector<1x16xf32>, vector<16x128xf32>, vector<1x128xf32> -> vector<1x128xf32>
    %123 = vector.broadcast %122 : vector<1x128xf32> to vector<32x128xf32>
    %124 = arith.mulf %99, %123 : vector<32x128xf32>
    %c0_97 = arith.constant 0 : index
    %c0_98 = arith.constant 0 : index
    %125 = vector.load %arg11[%c0_97, %c0_98] : memref<128x64xf32, #tpu.memory_space<vmem>>, vector<128x64xf32>
    %cst_99 = arith.constant dense<0.000000e+00> : vector<32x64xf32>
    %126 = tpu.matmul %124, %125, %cst_99 {dimension_numbers = #tpu.dot_dimension_numbers<[1], [0], [0], [1], [0, 0, 1, 1], [], []>} : vector<32x128xf32>, vector<128x64xf32>, vector<32x64xf32> -> vector<32x64xf32>
    %c0_100 = arith.constant 0 : index
    %c0_101 = arith.constant 0 : index
    %127 = vector.load %arg12[%c0_100, %c0_101] : memref<1x64xf32, #tpu.memory_space<vmem>>, vector<1x64xf32>
    %128 = vector.broadcast %127 : vector<1x64xf32> to vector<32x64xf32>
    %129 = arith.addf %126, %128 : vector<32x64xf32>
    %130 = arith.addf %129, %1 : vector<32x64xf32>
    %c0_102 = arith.constant 0 : index
    %c0_103 = arith.constant 0 : index
    %c0_104 = arith.constant 0 : index
    %131 = vector.load %arg13[%c0_102, %c0_103, %c0_104] : memref<1x32x64xf32, #tpu.memory_space<vmem>>, vector<1x32x64xf32>
    %132 = vector.shape_cast %131 : vector<1x32x64xf32> to vector<32x64xf32>
    %133 = vector.shape_cast %130 : vector<32x64xf32> to vector<1x32x64xf32>
    tpu.vector_store %arg13[%c0_102, %c0_103, %c0_104], %133 {strides = array<i32>} : memref<1x32x64xf32, #tpu.memory_space<vmem>>, vector<1x32x64xf32>,
    return
  }
  func.func @transform_0(%arg0: i32) -> (i32, i32, i32) {
    %c0_i32 = arith.constant 0 : i32
    %c0_i32_0 = arith.constant 0 : i32
    %c0_i32_1 = arith.constant 0 : i32
    return %arg0, %c0_i32, %c0_i32_0 : i32, i32, i32
  }
  func.func @transform_1(%arg0: i32) -> (i32, i32) {
    %c0_i32 = arith.constant 0 : i32
    %c0_i32_0 = arith.constant 0 : i32
    %c0_i32_1 = arith.constant 0 : i32
    return %c0_i32, %c0_i32_0 : i32, i32
  }
  func.func @transform_2(%arg0: i32) -> (i32, i32) {
    %c0_i32 = arith.constant 0 : i32
    %c0_i32_0 = arith.constant 0 : i32
    %c0_i32_1 = arith.constant 0 : i32
    return %c0_i32, %c0_i32_0 : i32, i32
  }
  func.func @transform_3(%arg0: i32) -> (i32, i32, i32) {
    %c0_i32 = arith.constant 0 : i32
    %c0_i32_0 = arith.constant 0 : i32
    %c0_i32_1 = arith.constant 0 : i32
    %c0_i32_2 = arith.constant 0 : i32
    return %c0_i32, %c0_i32_0, %c0_i32_1 : i32, i32, i32
  }
  func.func @transform_4(%arg0: i32) -> (i32, i32) {
    %c0_i32 = arith.constant 0 : i32
    %c0_i32_0 = arith.constant 0 : i32
    %c0_i32_1 = arith.constant 0 : i32
    return %c0_i32, %c0_i32_0 : i32, i32
  }
  func.func @transform_5(%arg0: i32) -> (i32, i32) {
    %c0_i32 = arith.constant 0 : i32
    %c0_i32_0 = arith.constant 0 : i32
    %c0_i32_1 = arith.constant 0 : i32
    return %c0_i32, %c0_i32_0 : i32, i32
  }
  func.func @transform_6(%arg0: i32) -> (i32, i32) {
    %c0_i32 = arith.constant 0 : i32
    %c0_i32_0 = arith.constant 0 : i32
    %c0_i32_1 = arith.constant 0 : i32
    return %c0_i32, %c0_i32_0 : i32, i32
  }
  func.func @transform_7(%arg0: i32) -> (i32, i32) {
    %c0_i32 = arith.constant 0 : i32
    %c0_i32_0 = arith.constant 0 : i32
    %c0_i32_1 = arith.constant 0 : i32
    return %c0_i32, %c0_i32_0 : i32, i32
  }
  func.func @transform_8(%arg0: i32) -> (i32, i32) {
    %c0_i32 = arith.constant 0 : i32
    %c0_i32_0 = arith.constant 0 : i32
    %c0_i32_1 = arith.constant 0 : i32
    return %c0_i32, %c0_i32_0 : i32, i32
  }
  func.func @transform_9(%arg0: i32) -> (i32, i32) {
    %c0_i32 = arith.constant 0 : i32
    %c0_i32_0 = arith.constant 0 : i32
    %c0_i32_1 = arith.constant 0 : i32
    return %c0_i32, %c0_i32_0 : i32, i32
  }
  func.func @transform_10(%arg0: i32) -> (i32, i32) {
    %c0_i32 = arith.constant 0 : i32
    %c0_i32_0 = arith.constant 0 : i32
    %c0_i32_1 = arith.constant 0 : i32
    return %c0_i32, %c0_i32_0 : i32, i32
  }
  func.func @transform_11(%arg0: i32) -> (i32, i32) {
    %c0_i32 = arith.constant 0 : i32
    %c0_i32_0 = arith.constant 0 : i32
    %c0_i32_1 = arith.constant 0 : i32
    return %c0_i32, %c0_i32_0 : i32, i32
  }
  func.func @transform_12(%arg0: i32) -> (i32, i32, i32) {
    %c0_i32 = arith.constant 0 : i32
    %c0_i32_0 = arith.constant 0 : i32
    %c0_i32_1 = arith.constant 0 : i32
    return %arg0, %c0_i32, %c0_i32_0 : i32, i32, i32
  }
}

</mosaic_0001>

<bundles_post_ra>
// kernel: tpu_custom_call.1
= control target key start
LH: loop header
LB: loop body
LE: loop exit
PB: predicated region body
PF: predicated region fallthrough
CT: control target
= control target key end

     0   :  { %17 = vsyncpa [#allocation4], 0  ;;  %s3464_s0 = inlined_call_operand.vmem [shape: f32[2,32,64], index: 0, kind: input, shape index: {}]   ;;  %s3465_s1 = inlined_call_operand.vmem [shape: f32[64,128], index: 1, kind: input, shape index: {}]   ;;  %s3466_s2 = inlined_call_operand.vmem [shape: f32[1,128], index: 2, kind: input, shape index: {}]   ;;  %s3467_s3 = inlined_call_operand.hbm [shape: f32[9,128,128], index: 3, kind: input, shape index: {}]   ;;  %s3468_s4 = inlined_call_operand.vmem [shape: f32[1,128], index: 4, kind: input, shape index: {}]   ;;  %s3469_s5 = inlined_call_operand.vmem [shape: f32[128,8], index: 5, kind: input, shape index: {}]   ;;  %s3470_s6 = inlined_call_operand.vmem [shape: f32[1,8], index: 6, kind: input, shape index: {}]   ;;  %s3471_s7 = inlined_call_operand.vmem [shape: f32[8,16], index: 7, kind: input, shape index: {}]   ;;  %s3472_s8 = inlined_call_operand.vmem [shape: f32[1,16], index: 8, kind: input, shape index: {}]   ;;  %s3473_s9 = inlined_call_operand.vmem [shape: f32[16,128], index: 9, kind: input, shape index: {}]   ;;  %s3474_s10 = inlined_call_operand.vmem [shape: f32[128,64], index: 10, kind: input, shape index: {}]   ;;  %s3475_s11 = inlined_call_operand.vmem [shape: f32[1,64], index: 11, kind: input, shape index: {}]   ;;  %s3476_s12 = inlined_call_operand.hbm [shape: f32[2,32,64], index: 12, kind: output, shape index: {}]  }
   0x1   :  { %18 = vsyncpa [#allocation5], 0 }
   0x2   :  { %20 = vsyncpa [#allocation5 + $0x1], 0  ;;  %s3075_s21 = smov 0   ;;  %s3077_s22 = smov 0  }
   0x3   :  { %s3079_s23 = smov 0   ;;  %s3081_s24 = smov 0  }
   0x4 LB: > { %3478 = sst [smem:[#allocation9_spill]] %s2996_s23  ;;  %s3096_s25 = sadd.s32 4294967295, %s3000_s24   ;;  %s3000_s24 = sphi %s3081_s24, %s3488_s24   ;;  %s2996_s23 = sphi %s3079_s23, %s3485_s23   ;;  %s2992_s22 = sphi %s3077_s22, %s3487_s22   ;;  %s2988_s21 = sphi %s3075_s21, %s3486_s21  }
   0x5   : > { %s2091_s26 = sadd.s32 4294967294, %s3000_s24   ;;  %s3100_s27 = sadd.s32 1, %s3000_s24  }
   0x6   : > { %s290_s28 = sadd.s32 1, %s2996_s23  ;;  %s287_s29 = ssub.s32 %s3000_s24, %s3100_s27 }
   0x7   : > { %p300_p0 = scmp.ne.s32.totalorder %s2996_s23, %s2992_s22  ;;  %p288_p1 = scmp.eq.s32.totalorder %s287_s29, 0 }
   0x8   : > { %p301_p2 = scmp.eq.s32.totalorder %s3096_s25, 1  ;;  %p306_p3 = scmp.ne.s32.totalorder %s2992_s22, %s2988_s21 }
   0x9   : > { %p307_p4 = scmp.eq.s32.totalorder %s2091_s26, 1  ;;  %p2092_p7 = scmp.ge.s32.totalorder %s3000_s24, 1 }
   0xa   : > { %s3111_s30 = scalar_select %p288_p1, %s2996_s23, %s290_s28  }
   0xb   : > { %p3113_p5 = por %p301_p2, %p300_p0  ;;  %p3117_p6 = por %p307_p4, %p306_p3 }
   0xc   : > { %3479 = sst [smem:[#allocation10_spill]] %s3111_s30  ;;  %p314_p8 = scmp.lt.s32.totalorder %s3000_s24, 3 }
   0xd   : > { %s3481_s14 = scalar_select %p3117_p6, 1, 0 }
   0xe   : > { %p2823_p9 = scmp.eq.s32.totalorder %s3096_s25, 0  ;;  %p3124_p10 = pnand %p2092_p7, %p314_p8 }
   0xf   : > { %s3002_s16 = smov [#allocation3]  }
  0x10   : > { %s332_s17 = sshll.u32 %s3002_s16, 4  ;;  %p2815_p11 = pneg %p3124_p10  ;;  %s333_s17 = int_to_ptr.vmem [resolvable:$true] %s332_s17 }
  0x11   : > { %s2921_s18 = scalar_lea.vmem %s333_s17, 18432  ;;  %p2929_p3 = scmp.lt.s32.totalorder %s333_s17, %s333_s17 }
  0x12   : > { %p2816_p12 = pnand %p2823_p9, %p2815_p11  ;;  %p2922_p0 = scmp.ne.s32.totalorder %s333_s17, %s2921_s18 }
  0x13   : > { %p2930_p4 = scmp.lt.s32.totalorder %s2921_s18, %s2921_s18 }
  0x14   : > { %p2912_p13 = pneg %p2816_p12 }
  0x15   : > { %p2931_p6 = por %p2930_p4, %p2929_p3 }
  0x16   : > { %p2924_p1 = pnand %p2922_p0, %p2912_p13 }
  0x18   : > { %p2925_p2 = pneg %p2924_p1 }
  0x1a   : > { %p2932_p7 = pnand %p2931_p6, %p2925_p2 }
  0x1c   : > { %2935 = shalt.err (!%p2932_p7)
}
  0x1d   : > { %s3003_s19 = smov 128   ;;  %s3004_s20 = smov 8  }
  0x1e   : > { %2818 = dma.hbm_to_vmem [thread:$0]  (!%p2816_p12), %s3467_s3, 18432, %s333_s17, [#allocation4], %s3003_s19, %s3003_s19, %s3004_s20  }
  0x1f   : > { %380 = sbr.rel (%p3124_p10) target bundleno = 1552 (0x610), region = 68 }
  0x24   : > { %2979 = dma.done.wait (%p2823_p9), [#allocation4], 18432  }
  0x25   : > { %2981 = vsyncadd (%p2823_p9), [#allocation4], 4294948864  ;;  %p422_p8 = scmp.lt.s32.totalorder %s3096_s25, 1  ;;  %v438_v0 = vld [vmem:[%s3465_s1 + $0x38] sm:$0xff]  ;;  %v437_v1 = vld [vmem:[%s3465_s1 + $0x30] sm:$0xff]  ;;  %vm446_vm0 = vcmask 523264  }
  0x26   : > { %2360 = vmatprep.subr.mxu0 %v438_v0  ;;  %v436_v2 = vld [vmem:[%s3465_s1 + $0x28] sm:$0xff]  ;;  %v435_v4 = vld [vmem:[%s3465_s1 + $0x20] sm:$0xff]  ;;  %v434_v5 = vld [vmem:[%s3465_s1 + $0x18] sm:$0xff]  ;;  %v3005_v40 = vmov 0.0   ;;  %vm3006_vm1 = vmmov 0   ;;  %vm1723_vm2 = vcmask 64512  }
  0x27   : > { %s423_s29 = scalar_select %p422_p8, %s3096_s25, 1  ;;  %2361 = vmatpush3.msra.mxu0 %v438_v0  ;;  %v433_v6 = vld [vmem:[%s3465_s1 + $0x10] sm:$0xff]  ;;  %v432_v7 = vld [vmem:[%s3465_s1 + $0x8] sm:$0xff]  ;;  %v431_v8 = vld [vmem:[%s3465_s1] sm:$0xff]  ;;  %572 = vst [vmem:[#allocation2] sm:$0xff] %v3005_v40  ;;  %2414 = vmatprep.mubr.f32.mxu1 %v3005_v40  ;;  %vm1805_vm3 = vcmask 130048  }
  0x28   : > { %2362 = vmatprep.subr.mxu0 %v437_v1  ;;  %v638_v12 = vld [vmem:[#allocation3 + $0xf8] sm:$0xff]  ;;  %v637_v13 = vld [vmem:[#allocation3 + $0xf0] sm:$0xff]  ;;  %v636_v14 = vld [vmem:[#allocation3 + $0xe8] sm:$0xff]  ;;  %573 = vst [vmem:[#allocation2 + $0x8] sm:$0xff] %v3005_v40  ;;  %s419_s26 = sand.u32 1, %s2992_s22   ;;  %s2125_s17 = sshll.u32 %s3096_s25, 9 }
  0x29   : > { %s2124_s16 = sshll.u32 %s423_s29, 5  ;;  %2363 = vmatpush3.msra.mxu0 %v437_v1  ;;  %2382 = vmatprep.subr.mxu1 %v638_v12  ;;  %v635_v15 = vld [vmem:[#allocation3 + $0xe0] sm:$0xff]  ;;  %v617_v16 = vld [vmem:[#allocation3 + $0x78] sm:$0xff]  ;;  %v616_v18 = vld [vmem:[#allocation3 + $0x70] sm:$0xff]  ;;  %574 = vst [vmem:[#allocation2 + $0x10] sm:$0xff] %v3005_v40  ;;  %s2097_s29 = sshll.u32 %s419_s26, 5 }
  0x2a   : > { %s3146_s23 = scalar_lea.vmem %s3464_s0, %s2124_s16  ;;  %2364 = vmatprep.subr.mxu0 %v436_v2  ;;  %2383 = vmatpush3.msra.mxu1 %v638_v12  ;;  %v634_v17 = vld [vmem:[#allocation3 + $0xd8] sm:$0xff]  ;;  %v633_v19 = vld [vmem:[#allocation3 + $0xd0] sm:$0xff]  ;;  %v615_v20 = vld [vmem:[#allocation3 + $0x68] sm:$0xff]  ;;  %575 = vst [vmem:[#allocation2 + $0x18] sm:$0xff] %v3005_v40  ;;  %s421_s16 = scalar_lea.vmem [#allocation6], %s2097_s29 }
  0x2b   : > { %v427_v3 = vld [vmem:[%s3146_s23] sm:$0xff]  ;;  %2365 = vmatpush3.msra.mxu0 %v436_v2  ;;  %v428_v9 = vld [vmem:[%s3146_s23 + $0x8] sm:$0xff]  ;;  %v429_v10 = vld [vmem:[%s3146_s23 + $0x10] sm:$0xff]  ;;  %2384 = vmatprep.subr.mxu1 %v637_v13  ;;  %577 = vst [vmem:[#allocation2 + $0x28] sm:$0xff] %v3005_v40  ;;  %s2017_s18 = sshll.u32 %s421_s16, 4  ;;  %s3419_s20 = scalar_lea.hbm %s3476_s12, %s2125_s17  ;;  %s3414_s18 = int_to_ptr.vmem [resolvable:$true] %s2017_s18 }
  0x2c   : > { %2376 = vmatprep.mubr.msk.f32.mxu0 %vm446_vm0, %v427_v3  ;;  %2366 = vmatprep.subr.mxu0 %v435_v4  ;;  %v430_v11 = vld [vmem:[%s3146_s23 + $0x18] sm:$0xff]  ;;  %v614_v22 = vld [vmem:[#allocation3 + $0x60] sm:$0xff]  ;;  %v613_v24 = vld [vmem:[#allocation3 + $0x58] sm:$0xff]  ;;  %578 = vst [vmem:[#allocation2 + $0x30] sm:$0xff] %v3005_v40  ;;  %s3424_s25 = scalar_lea.sflag [#allocation5], %s419_s26  ;;  %s2936_s28 = scalar_lea.vmem %s3414_s18, 512 }
  0x2d   : > { %2367 = vmatpush3.msra.mxu0 %v435_v4  ;;  %2385 = vmatpush3.msra.mxu1 %v637_v13  ;;  %v632_v21 = vld [vmem:[#allocation3 + $0xc8] sm:$0xff]  ;;  %v631_v23 = vld [vmem:[#allocation3 + $0xc0] sm:$0xff]  ;;  %v630_v25 = vld [vmem:[#allocation3 + $0xb8] sm:$0xff]  ;;  %580 = vst [vmem:[#allocation2 + $0x40] sm:$0xff] %v3005_v40  ;;  %p2937_p6 = scmp.ne.s32.totalorder %s3414_s18, %s2936_s28  ;;  %s3007_s30 = smov [#allocation6]  }
  0x2e   : > { %2368 = vmatprep.subr.mxu0 %v434_v5  ;;  %2386 = vmatprep.subr.mxu1 %v636_v14  ;;  %v612_v26 = vld [vmem:[#allocation3 + $0x50] sm:$0xff]  ;;  %v611_v28 = vld [vmem:[#allocation3 + $0x48] sm:$0xff]  ;;  %v610_v30 = vld [vmem:[#allocation3 + $0x40] sm:$0xff]  ;;  %581 = vst [vmem:[#allocation2 + $0x48] sm:$0xff] %v3005_v40  ;;  %s2940_s29 = sshll.u32 %s3007_s30, 4  ;;  %s2941_s29 = int_to_ptr.vmem [resolvable:$false] %s2940_s29 }
  0x2f   : > { %2369 = vmatpush3.msra.mxu0 %v434_v5  ;;  %2387 = vmatpush3.msra.mxu1 %v636_v14  ;;  %v629_v27 = vld [vmem:[#allocation3 + $0xb0] sm:$0xff]  ;;  %v628_v29 = vld [vmem:[#allocation3 + $0xa8] sm:$0xff]  ;;  %v627_v31 = vld [vmem:[#allocation3 + $0xa0] sm:$0xff]  ;;  %583 = vst [vmem:[#allocation2 + $0x58] sm:$0xff] %v3005_v40  ;;  %p2938_p9 = pnand %p2937_p6, %p3113_p5  ;;  %s2942_s19 = scalar_lea.vmem %s2941_s29, 1024 }
  0x30   : > { %2370 = vmatprep.subr.mxu0 %v433_v6  ;;  %2388 = vmatprep.subr.mxu1 %v635_v15  ;;  %v609_v32 = vld [vmem:[#allocation3 + $0x38] sm:$0xff]  ;;  %v608_v34 = vld [vmem:[#allocation3 + $0x30] sm:$0xff]  ;;  %v607_v36 = vld [vmem:[#allocation3 + $0x28] sm:$0xff]  ;;  %584 = vst [vmem:[#allocation2 + $0x60] sm:$0xff] %v3005_v40  ;;  %p2943_p11 = scmp.lt.s32.totalorder %s3414_s18, %s2941_s29  ;;  %p2944_p12 = scmp.lt.s32.totalorder %s2942_s19, %s2936_s28 }
  0x31   : > { %2371 = vmatpush3.msra.mxu0 %v433_v6  ;;  %2389 = vmatpush3.msra.mxu1 %v635_v15  ;;  %v626_v33 = vld [vmem:[#allocation3 + $0x98] sm:$0xff]  ;;  %v625_v35 = vld [vmem:[#allocation3 + $0x90] sm:$0xff]  ;;  %v624_v37 = vld [vmem:[#allocation3 + $0x88] sm:$0xff]  ;;  %586 = vst [vmem:[#allocation2 + $0x70] sm:$0xff] %v3005_v40  ;;  %p2939_p10 = pneg %p2938_p9 }
  0x32   : > { %2372 = vmatprep.subr.mxu0 %v432_v7  ;;  %2390 = vmatprep.subr.mxu1 %v634_v17  ;;  %v606_v38 = vld [vmem:[#allocation3 + $0x20] sm:$0xff]  ;;  %587 = vst [vmem:[#allocation2 + $0x78] sm:$0xff] %v3005_v40  ;;  %588 = vst [vmem:[#allocation2 + $0x80] sm:$0xff] %v3005_v40  ;;  %v605_v41 = vld [vmem:[#allocation3 + $0x18] sm:$0xff]  ;;  %p2945_p13 = por %p2944_p12, %p2943_p11 }
  0x33   : > { %2373 = vmatpush3.msra.mxu0 %v432_v7  ;;  %2391 = vmatpush3.msra.mxu1 %v634_v17  ;;  %v623_v39 = vld [vmem:[#allocation3 + $0x80] sm:$0xff]  ;;  %589 = vst [vmem:[#allocation2 + $0x88] sm:$0xff] %v3005_v40  ;;  %v829_v42 = vld [vmem:[#allocation3 + $0x178] sm:$0xff]  ;;  %v604_v43 = vld [vmem:[#allocation3 + $0x10] sm:$0xff] }
  0x34   : > { %2374 = vmatprep.subr.mxu0 %v431_v8  ;;  %2392 = vmatprep.subr.mxu1 %v633_v19  ;;  %v603_v44 = vld [vmem:[#allocation3 + $0x8] sm:$0xff]  ;;  %v602_v45 = vld [vmem:[#allocation3] sm:$0xff]  ;;  %v598_v46 = vld [vmem:[#allocation2 + $0x7] sm:$0xff]  ;;  %p2946_p0 = pnand %p2945_p13, %p2939_p10 }
  0x35   : > { %2375 = vmatpush3.msra.mxu0 %v431_v8  ;;  %2393 = vmatpush3.msra.mxu1 %v633_v19  ;;  %v3195_v47 = vld [vmem:[#allocation3 + $0x1f8] sm:$0xff]  ;;  %v2100_v48 = vld [vmem:[%s3466_s2] ss:$0 sm:$0xff]  ;;  %v827_v13 = vld [vmem:[#allocation3 + $0x168] sm:$0xff] }
  0x36   : > { %2377 = vmatmul.mubr.msk.f32.vlgmr.msra.gmra.mxu0 %vm446_vm0, %v428_v9  ;;  %2420 = vmatprep.subr.mxu0 %v617_v16  ;;  %v809_v15 = vld [vmem:[#allocation2 + $0x9] sm:$0xff]  ;;  %v938_v19 = vld [vmem:[#allocation3 + $0x1f0] sm:$0xff] }
  0x37   : > { %2379 = vmatprep.mubr.msk.f32.mxu0 %vm446_vm0, %v429_v10  ;;  %2421 = vmatpush3.msra.mxu0 %v617_v16  ;;  %v828_v10 = vld [vmem:[#allocation3 + $0x170] sm:$0xff]  ;;  %v826_v16 = vld [vmem:[#allocation3 + $0x160] sm:$0xff]  ;;  %v825_v17 = vld [vmem:[#allocation3 + $0x158] sm:$0xff] }
  0x38   : > { %2422 = vmatprep.subr.mxu0 %v616_v18  ;;  %2394 = vmatprep.subr.mxu1 %v632_v21 }
  0x39   : > { %2423 = vmatpush3.msra.mxu0 %v616_v18  ;;  %2395 = vmatpush3.msra.mxu1 %v632_v21  ;;  %v824_v21 = vld [vmem:[#allocation3 + $0x150] sm:$0xff] }
  0x3a   : > { %2380 = vmatmul.mubr.msk.f32.gmra.mxu0 %vm446_vm0, %v430_v11  ;;  %2424 = vmatprep.subr.mxu0 %v615_v20 }
  0x3b   : > { %2425 = vmatpush3.msra.mxu0 %v615_v20  ;;  %2396 = vmatprep.subr.mxu1 %v631_v23 }
  0x3c   : > { %2426 = vmatprep.subr.mxu0 %v614_v22  ;;  %2397 = vmatpush3.msra.mxu1 %v631_v23 }
  0x3d   : > { %2427 = vmatpush3.msra.mxu0 %v614_v22  ;;  %2398 = vmatprep.subr.mxu1 %v630_v25  ;;  %v937_v22 = vld [vmem:[#allocation3 + $0x1e8] sm:$0xff] }
  0x3e   : > { %2428 = vmatprep.subr.mxu0 %v613_v24  ;;  %2399 = vmatpush3.msra.mxu1 %v630_v25  ;;  %v823_v25 = vld [vmem:[#allocation3 + $0x148] sm:$0xff] }
  0x3f   : > { %2429 = vmatpush3.msra.mxu0 %v613_v24  ;;  %2400 = vmatprep.subr.mxu1 %v629_v27  ;;  %v936_v24 = vld [vmem:[#allocation3 + $0x1e0] sm:$0xff] }
  0x40   : > { %2430 = vmatprep.subr.mxu0 %v612_v26  ;;  %2401 = vmatpush3.msra.mxu1 %v629_v27  ;;  %v822_v27 = vld [vmem:[#allocation3 + $0x140] sm:$0xff] }
  0x41   : > { %2431 = vmatpush3.msra.mxu0 %v612_v26  ;;  %2402 = vmatprep.subr.mxu1 %v628_v29  ;;  %v935_v26 = vld [vmem:[#allocation3 + $0x1d8] sm:$0xff] }
  0x42   : > { %2432 = vmatprep.subr.mxu0 %v611_v28  ;;  %2403 = vmatpush3.msra.mxu1 %v628_v29  ;;  %v821_v29 = vld [vmem:[#allocation3 + $0x138] sm:$0xff] }
  0x43   : > { %2433 = vmatpush3.msra.mxu0 %v611_v28  ;;  %2404 = vmatprep.subr.mxu1 %v627_v31  ;;  %v934_v28 = vld [vmem:[#allocation3 + $0x1d0] sm:$0xff] }
  0x44   : > { %2434 = vmatprep.subr.mxu0 %v610_v30  ;;  %2405 = vmatpush3.msra.mxu1 %v627_v31  ;;  %v820_v31 = vld [vmem:[#allocation3 + $0x130] sm:$0xff] }
  0x45   : > { %2435 = vmatpush3.msra.mxu0 %v610_v30  ;;  %2406 = vmatprep.subr.mxu1 %v626_v33  ;;  %v933_v30 = vld [vmem:[#allocation3 + $0x1c8] sm:$0xff] }
  0x46   : > { %2436 = vmatprep.subr.mxu0 %v609_v32  ;;  %2407 = vmatpush3.msra.mxu1 %v626_v33  ;;  %v819_v33 = vld [vmem:[#allocation3 + $0x128] sm:$0xff] }
  0x47   : > { %2437 = vmatpush3.msra.mxu0 %v609_v32  ;;  %2408 = vmatprep.subr.mxu1 %v625_v35  ;;  %v932_v32 = vld [vmem:[#allocation3 + $0x1c0] sm:$0xff] }
  0x48   : > { %2438 = vmatprep.subr.mxu0 %v608_v34  ;;  %2409 = vmatpush3.msra.mxu1 %v625_v35  ;;  %v818_v35 = vld [vmem:[#allocation3 + $0x120] sm:$0xff] }
  0x49   : > { %2439 = vmatpush3.msra.mxu0 %v608_v34  ;;  %2410 = vmatprep.subr.mxu1 %v624_v37  ;;  %v931_v34 = vld [vmem:[#allocation3 + $0x1b8] sm:$0xff] }
  0x4a   : > { %2440 = vmatprep.subr.mxu0 %v607_v36  ;;  %2411 = vmatpush3.msra.mxu1 %v624_v37  ;;  %v817_v37 = vld [vmem:[#allocation3 + $0x118] sm:$0xff] }
  0x4b   : > { %2441 = vmatpush3.msra.mxu0 %v607_v36  ;;  %2412 = vmatprep.subr.mxu1 %v623_v39  ;;  %v930_v36 = vld [vmem:[#allocation3 + $0x1b0] sm:$0xff] }
  0x4c   : > { %2442 = vmatprep.subr.mxu0 %v606_v38  ;;  %2413 = vmatpush3.msra.mxu1 %v623_v39  ;;  %v816_v39 = vld [vmem:[#allocation3 + $0x110] sm:$0xff] }
  0x4d   : > { %2443 = vmatpush3.msra.mxu0 %v606_v38  ;;  %2458 = vmatprep.subr.mxu1 %v829_v42  ;;  %v929_v38 = vld [vmem:[#allocation3 + $0x1a8] sm:$0xff] }
  0x4e   : > { %2444 = vmatprep.subr.mxu0 %v605_v41  ;;  %2452 = vmatprep.mubr.f32.mxu0 %v598_v46  ;;  %v925_v46 = vld [vmem:[#allocation3 + $0x188] sm:$0xff] }
  0x4f   : > { %2445 = vmatpush3.msra.mxu0 %v605_v41  ;;  %v928_v41 = vld [vmem:[#allocation3 + $0x1a0] sm:$0xff] }
  0x50   : > { %2446 = vmatprep.subr.mxu0 %v604_v43 }
  0x51   : > { %2447 = vmatpush3.msra.mxu0 %v604_v43  ;;  %v927_v43 = vld [vmem:[#allocation3 + $0x198] sm:$0xff] }
  0x52   : > { %2448 = vmatprep.subr.mxu0 %v603_v44 }
  0x53   : > { %2449 = vmatpush3.msra.mxu0 %v603_v44  ;;  %v814_v44 = vld [vmem:[#allocation3 + $0x100] sm:$0xff] }
  0x54   : > { %2450 = vmatprep.subr.mxu0 %v602_v45 }
  0x55   : > { %2451 = vmatpush3.msra.mxu0 %v602_v45  ;;  %v926_v45 = vld [vmem:[#allocation3 + $0x190] sm:$0xff] }
  0x56   : > { %2496 = vmatprep.subr.mxu0 %v3195_v47 }
  0xf6   : > { %v2378_v49 = vpop.f32.mrf.mxu0 }
  0xf7   : > { %v531_v50 = vadd.f32 %v2378_v49, %v2100_v48  ;;  %v924_v49 = vld [vmem:[#allocation3 + $0x180] sm:$0xff] }
  0xf8   : > { %v525_v51 = vpop.f32.mrf.mxu0 }
  0xf9   : > { %v2106_v52 = vmul.f32 -1.442695, %v531_v50  ;;  %v526_v53 = vadd.f32 %v2100_v48, %v525_v51  ;;  %v1048_v51 = vld [vmem:[#allocation3 + $0x270] sm:$0xff] }
  0xfa   : > { %v2381_v54 = vpop.f32.mrf.mxu0 }
  0xfb   : > { %2865 = vpow2.f32 %v2106_v52  ;;  %v2105_v55 = vmul.f32 -1.442695, %v526_v53  ;;  %v541_v56 = vadd.f32 %v2381_v54, %v2100_v48  ;;  %v1159_v52 = vld [vmem:[#allocation3 + $0x2f8] sm:$0xff]  ;;  %v1047_v54 = vld [vmem:[#allocation3 + $0x268] sm:$0xff] }
  0xfc   : > { %v535_v57 = vpop.f32.mrf.mxu0 }
  0xfd   : > { %2867 = vpow2.f32 %v2105_v55  ;;  %v2108_v58 = vmul.f32 -1.442695, %v541_v56  ;;  %v536_v59 = vadd.f32 %v2100_v48, %v535_v57 }
  0xff   : > { %2869 = vpow2.f32 %v2108_v58  ;;  %v2107_v60 = vmul.f32 -1.442695, %v536_v59  ;;  %v1046_v58 = vld [vmem:[#allocation3 + $0x260] sm:$0xff] }
 0x101   : > { %2871 = vpow2.f32 %v2107_v60  ;;  %v1045_v60 = vld [vmem:[#allocation3 + $0x258] sm:$0xff] }
 0x108   : > { %v2866_v61 = vpop.eup %2865 }
 0x109   : > { %v557_v62 = vadd.f32 1.0, %v2866_v61  ;;  %v1155_v61 = vld [vmem:[#allocation3 + $0x2d8] sm:$0xff] }
 0x10a   : > { %v2868_v63 = vpop.eup %2867 }
 0x10b   : > { %2873 = vrcp.f32 %v557_v62  ;;  %v556_v0 = vadd.f32 1.0, %v2868_v63  ;;  %v1044_v62 = vld [vmem:[#allocation3 + $0x250] sm:$0xff] }
 0x10c   : > { %v2870_v1 = vpop.eup %2869  ;;  %v1154_v63 = vld [vmem:[#allocation3 + $0x2d0] sm:$0xff] }
 0x10d   : > { %2875 = vrcp.f32 %v556_v0  ;;  %v559_v2 = vadd.f32 1.0, %v2870_v1  ;;  %v1043_v0 = vld [vmem:[#allocation3 + $0x248] sm:$0xff] }
 0x10e   : > { %v2872_v3 = vpop.eup %2871  ;;  %v1153_v1 = vld [vmem:[#allocation3 + $0x2c8] sm:$0xff] }
 0x10f   : > { %2877 = vrcp.f32 %v559_v2  ;;  %v558_v4 = vadd.f32 1.0, %v2872_v3  ;;  %v1042_v2 = vld [vmem:[#allocation3 + $0x240] sm:$0xff] }
 0x110   : > { %v1152_v3 = vld [vmem:[#allocation3 + $0x2c0] sm:$0xff] }
 0x111   : > { %2879 = vrcp.f32 %v558_v4  ;;  %v1041_v4 = vld [vmem:[#allocation3 + $0x238] sm:$0xff] }
 0x118   : > { %v2874_v5 = vpop.eup %2873 }
 0x119   : > { %v3201_v6 = vmul.f32 %v2874_v5, %v531_v50  ;;  %v1151_v5 = vld [vmem:[#allocation3 + $0x2b8] sm:$0xff] }
 0x11a   : > { %v2876_v7 = vpop.eup %2875 }
 0x11b   : > { %593 = vst [vmem:[#allocation2 + $0x38] sm:$0xff] %v3201_v6  ;;  %v3204_v8 = vmul.f32 %v2876_v7, %v526_v53  ;;  %v1158_v53 = vld [vmem:[#allocation3 + $0x2f0] sm:$0xff] }
 0x11c   : > { %v2878_v9 = vpop.eup %2877  ;;  %v1040_v7 = vld [vmem:[#allocation3 + $0x230] sm:$0xff] }
 0x11d   : > { %591 = vst [vmem:[#allocation2 + $0x20] sm:$0xff] %v3204_v8  ;;  %v3207_v11 = vmul.f32 %v2878_v9, %v541_v56  ;;  %2415 = vmatmul.mubr.f32.vlgmr.msra.gmra.mxu1 %v3204_v8  ;;  %v1157_v56 = vld [vmem:[#allocation3 + $0x2e8] sm:$0xff] }
 0x11e   : > { %v2880_v12 = vpop.eup %2879  ;;  %2459 = vmatpush3.msra.mxu1 %v829_v42  ;;  %2417 = vmatprep.mubr.f32.mxu1 %v3201_v6  ;;  %v815_v42 = vld [vmem:[#allocation3 + $0x108] sm:$0xff] }
 0x11f   : > { %597 = vst [vmem:[#allocation2 + $0x68] sm:$0xff] %v3207_v11  ;;  %v3212_v14 = vmul.f32 %v2880_v12, %v536_v59  ;;  %2460 = vmatprep.subr.mxu1 %v828_v10  ;;  %v1156_v59 = vld [vmem:[#allocation3 + $0x2e0] sm:$0xff]  ;;  %v1039_v9 = vld [vmem:[#allocation3 + $0x228] sm:$0xff] }
 0x120   : > { %2461 = vmatpush3.msra.mxu1 %v828_v10  ;;  %v1149_v10 = vld [vmem:[#allocation3 + $0x2a8] sm:$0xff]  ;;  %v1038_v12 = vld [vmem:[#allocation3 + $0x220] sm:$0xff] }
 0x121   : > { %595 = vst [vmem:[#allocation2 + $0x50] sm:$0xff] %v3212_v14  ;;  %2462 = vmatprep.subr.mxu1 %v827_v13  ;;  %2418 = vmatmul.mubr.f32.gmra.mxu1 %v3212_v14 }
 0x122   : > { %2463 = vmatpush3.msra.mxu1 %v827_v13  ;;  %2490 = vmatprep.mubr.f32.mxu1 %v809_v15  ;;  %v3216_v20 = vld [vmem:[#allocation2 + $0x37] sm:$0xff]  ;;  %v1037_v15 = vld [vmem:[#allocation3 + $0x218] sm:$0xff] }
 0x123   : > { %2464 = vmatprep.subr.mxu1 %v826_v16  ;;  %v3223_v50 = vld [vmem:[#allocation2 + $0x39] sm:$0xff]  ;;  %v1148_v13 = vld [vmem:[#allocation3 + $0x2a0] sm:$0xff] }
 0x124   : > { %v599_v18 = vld [vmem:[#allocation2 + $0x1f] sm:$0xff]  ;;  %2465 = vmatpush3.msra.mxu1 %v826_v16  ;;  %v1147_v16 = vld [vmem:[#allocation3 + $0x298] sm:$0xff] }
 0x125   : > { %2453 = vmatmul.mubr.f32.vlgmr.msra.gmra.mxu0 %v599_v18  ;;  %2466 = vmatprep.subr.mxu1 %v825_v17  ;;  %v810_v48 = vld [vmem:[#allocation2 + $0x21] sm:$0xff] }
 0x126   : > { %2497 = vmatpush3.msra.mxu0 %v3195_v47  ;;  %2455 = vmatprep.mubr.f32.mxu0 %v3216_v20  ;;  %v1049_v47 = vld [vmem:[#allocation3 + $0x278] sm:$0xff] }
 0x127   : > { %2498 = vmatprep.subr.mxu0 %v938_v19  ;;  %2467 = vmatpush3.msra.mxu1 %v825_v17  ;;  %v3231_v57 = vld [vmem:[#allocation2 + $0x67] sm:$0xff] }
 0x128   : > { %2499 = vmatpush3.msra.mxu0 %v938_v19  ;;  %v3220_v23 = vld [vmem:[#allocation2 + $0x4f] sm:$0xff]  ;;  %2468 = vmatprep.subr.mxu1 %v824_v21  ;;  %v1036_v17 = vld [vmem:[#allocation3 + $0x210] sm:$0xff]  ;;  %v1035_v19 = vld [vmem:[#allocation3 + $0x208] sm:$0xff] }
 0x129   : > { %2500 = vmatprep.subr.mxu0 %v937_v22  ;;  %2456 = vmatmul.mubr.f32.gmra.mxu0 %v3220_v23  ;;  %v3228_v55 = vld [vmem:[#allocation2 + $0x51] sm:$0xff] }
 0x12a   : > { %2501 = vmatpush3.msra.mxu0 %v937_v22  ;;  %2528 = vmatprep.mubr.f32.mxu0 %v599_v18  ;;  %v1146_v18 = vld [vmem:[#allocation3 + $0x290] sm:$0xff]  ;;  %v1034_v22 = vld [vmem:[#allocation3 + $0x200] sm:$0xff] }
 0x12b   : > { %2502 = vmatprep.subr.mxu0 %v936_v24  ;;  %2469 = vmatpush3.msra.mxu1 %v824_v21  ;;  %v1145_v21 = vld [vmem:[#allocation3 + $0x288] sm:$0xff] }
 0x12c   : > { %2503 = vmatpush3.msra.mxu0 %v936_v24  ;;  %2470 = vmatprep.subr.mxu1 %v823_v25  ;;  %v1144_v24 = vld [vmem:[#allocation3 + $0x280] sm:$0xff] }
 0x12d   : > { %2504 = vmatprep.subr.mxu0 %v935_v26  ;;  %2471 = vmatpush3.msra.mxu1 %v823_v25  ;;  %v1269_v25 = vld [vmem:[#allocation3 + $0x378] sm:$0xff] }
 0x12e   : > { %2505 = vmatpush3.msra.mxu0 %v935_v26  ;;  %2472 = vmatprep.subr.mxu1 %v822_v27  ;;  %v1379_v26 = vld [vmem:[#allocation3 + $0x3f8] sm:$0xff] }
 0x12f   : > { %2506 = vmatprep.subr.mxu0 %v934_v28  ;;  %2473 = vmatpush3.msra.mxu1 %v822_v27  ;;  %v1268_v27 = vld [vmem:[#allocation3 + $0x370] sm:$0xff] }
 0x130   : > { %2507 = vmatpush3.msra.mxu0 %v934_v28  ;;  %2474 = vmatprep.subr.mxu1 %v821_v29  ;;  %v1378_v28 = vld [vmem:[#allocation3 + $0x3f0] sm:$0xff] }
 0x131   : > { %2508 = vmatprep.subr.mxu0 %v933_v30  ;;  %2475 = vmatpush3.msra.mxu1 %v821_v29  ;;  %v1267_v29 = vld [vmem:[#allocation3 + $0x368] sm:$0xff] }
 0x132   : > { %2509 = vmatpush3.msra.mxu0 %v933_v30  ;;  %2476 = vmatprep.subr.mxu1 %v820_v31  ;;  %v1377_v30 = vld [vmem:[#allocation3 + $0x3e8] sm:$0xff] }
 0x133   : > { %2510 = vmatprep.subr.mxu0 %v932_v32  ;;  %2477 = vmatpush3.msra.mxu1 %v820_v31  ;;  %v3240_v31 = vld [vmem:[#allocation2 + $0x69] sm:$0xff] }
 0x134   : > { %2511 = vmatpush3.msra.mxu0 %v932_v32  ;;  %2478 = vmatprep.subr.mxu1 %v819_v33  ;;  %v1266_v32 = vld [vmem:[#allocation3 + $0x360] sm:$0xff] }
 0x135   : > { %2512 = vmatprep.subr.mxu0 %v931_v34  ;;  %2479 = vmatpush3.msra.mxu1 %v819_v33  ;;  %v1376_v33 = vld [vmem:[#allocation3 + $0x3e0] sm:$0xff] }
 0x136   : > { %2513 = vmatpush3.msra.mxu0 %v931_v34  ;;  %2480 = vmatprep.subr.mxu1 %v818_v35  ;;  %v1265_v34 = vld [vmem:[#allocation3 + $0x358] sm:$0xff] }
 0x137   : > { %2514 = vmatprep.subr.mxu0 %v930_v36  ;;  %2481 = vmatpush3.msra.mxu1 %v818_v35  ;;  %v1375_v35 = vld [vmem:[#allocation3 + $0x3d8] sm:$0xff] }
 0x138   : > { %2515 = vmatpush3.msra.mxu0 %v930_v36  ;;  %2482 = vmatprep.subr.mxu1 %v817_v37  ;;  %v1264_v36 = vld [vmem:[#allocation3 + $0x350] sm:$0xff] }
 0x139   : > { %2516 = vmatprep.subr.mxu0 %v929_v38  ;;  %2483 = vmatpush3.msra.mxu1 %v817_v37  ;;  %v1374_v37 = vld [vmem:[#allocation3 + $0x3d0] sm:$0xff] }
 0x13a   : > { %2517 = vmatpush3.msra.mxu0 %v929_v38  ;;  %2484 = vmatprep.subr.mxu1 %v816_v39  ;;  %v1263_v38 = vld [vmem:[#allocation3 + $0x348] sm:$0xff] }
 0x13b   : > { %2518 = vmatprep.subr.mxu0 %v928_v41  ;;  %2485 = vmatpush3.msra.mxu1 %v816_v39  ;;  %v1373_v39 = vld [vmem:[#allocation3 + $0x3c8] sm:$0xff] }
 0x13c   : > { %2519 = vmatpush3.msra.mxu0 %v928_v41  ;;  %2486 = vmatprep.subr.mxu1 %v815_v42  ;;  %v1261_v41 = vld [vmem:[#allocation3 + $0x338] sm:$0xff] }
 0x13d   : > { %2520 = vmatprep.subr.mxu0 %v927_v43  ;;  %2487 = vmatpush3.msra.mxu1 %v815_v42  ;;  %v1371_v42 = vld [vmem:[#allocation3 + $0x3b8] sm:$0xff] }
 0x13e   : > { %2521 = vmatpush3.msra.mxu0 %v927_v43  ;;  %2488 = vmatprep.subr.mxu1 %v814_v44  ;;  %v1260_v43 = vld [vmem:[#allocation3 + $0x330] sm:$0xff] }
 0x13f   : > { %2522 = vmatprep.subr.mxu0 %v926_v45  ;;  %2489 = vmatpush3.msra.mxu1 %v814_v44  ;;  %v1370_v44 = vld [vmem:[#allocation3 + $0x3b0] sm:$0xff] }
 0x140   : > { %2523 = vmatpush3.msra.mxu0 %v926_v45  ;;  %2491 = vmatmul.mubr.f32.vlgmr.msra.gmra.mxu1 %v810_v48  ;;  %v1259_v45 = vld [vmem:[#allocation3 + $0x328] sm:$0xff] }
 0x141   : > { %2524 = vmatprep.subr.mxu0 %v925_v46  ;;  %2534 = vmatprep.subr.mxu1 %v1049_v47 }
 0x142   : > { %2525 = vmatpush3.msra.mxu0 %v925_v46  ;;  %2493 = vmatprep.mubr.f32.mxu1 %v3223_v50  ;;  %v1369_v46 = vld [vmem:[#allocation3 + $0x3a8] sm:$0xff] }
 0x143   : > { %2526 = vmatprep.subr.mxu0 %v924_v49  ;;  %2535 = vmatpush3.msra.mxu1 %v1049_v47  ;;  %v1258_v47 = vld [vmem:[#allocation3 + $0x320] sm:$0xff] }
 0x144   : > { %2527 = vmatpush3.msra.mxu0 %v924_v49  ;;  %2536 = vmatprep.subr.mxu1 %v1048_v51  ;;  %v1257_v49 = vld [vmem:[#allocation3 + $0x318] sm:$0xff] }
 0x145   : > { %2529 = vmatmul.mubr.f32.vlgmr.msra.gmra.mxu0 %v3216_v20  ;;  %2572 = vmatprep.subr.mxu0 %v1159_v52 }
 0x146   : > { %2531 = vmatprep.mubr.f32.mxu0 %v3220_v23  ;;  %2573 = vmatpush3.msra.mxu0 %v1159_v52  ;;  %v1256_v52 = vld [vmem:[#allocation3 + $0x310] sm:$0xff] }
 0x147   : > { %2574 = vmatprep.subr.mxu0 %v1158_v53  ;;  %2537 = vmatpush3.msra.mxu1 %v1048_v51  ;;  %v1367_v51 = vld [vmem:[#allocation3 + $0x398] sm:$0xff] }
 0x148   : > { %2575 = vmatpush3.msra.mxu0 %v1158_v53  ;;  %2494 = vmatmul.mubr.f32.gmra.mxu1 %v3228_v55  ;;  %v1366_v53 = vld [vmem:[#allocation3 + $0x390] sm:$0xff] }
 0x149   : > { %2532 = vmatmul.mubr.f32.gmra.mxu0 %v3231_v57  ;;  %2538 = vmatprep.subr.mxu1 %v1047_v54 }
 0x14a   : > { %2576 = vmatprep.subr.mxu0 %v1157_v56  ;;  %2539 = vmatpush3.msra.mxu1 %v1047_v54  ;;  %v1255_v54 = vld [vmem:[#allocation3 + $0x308] sm:$0xff] }
 0x14b   : > { %2566 = vmatprep.mubr.f32.mxu1 %v3204_v8  ;;  %2577 = vmatpush3.msra.mxu0 %v1157_v56  ;;  %v1150_v8 = vld [vmem:[#allocation3 + $0x2b0] sm:$0xff]  ;;  %v1365_v56 = vld [vmem:[#allocation3 + $0x388] sm:$0xff] }
 0x14c   : > { %2604 = vmatprep.mubr.f32.mxu0 %v810_v48  ;;  %2540 = vmatprep.subr.mxu1 %v1046_v58  ;;  %v1368_v48 = vld [vmem:[#allocation3 + $0x3a0] sm:$0xff] }
 0x14d   : > { %2578 = vmatprep.subr.mxu0 %v1156_v59  ;;  %2541 = vmatpush3.msra.mxu1 %v1046_v58  ;;  %v1254_v58 = vld [vmem:[#allocation3 + $0x300] sm:$0xff] }
 0x14e   : > { %2579 = vmatpush3.msra.mxu0 %v1156_v59  ;;  %2542 = vmatprep.subr.mxu1 %v1045_v60  ;;  %v1364_v59 = vld [vmem:[#allocation3 + $0x380] sm:$0xff] }
 0x14f   : > { %2580 = vmatprep.subr.mxu0 %v1155_v61  ;;  %2543 = vmatpush3.msra.mxu1 %v1045_v60  ;;  %v1489_v60 = vld [vmem:[#allocation3 + $0x478] sm:$0xff] }
 0x150   : > { %2581 = vmatpush3.msra.mxu0 %v1155_v61  ;;  %2544 = vmatprep.subr.mxu1 %v1044_v62  ;;  %v1488_v61 = vld [vmem:[#allocation3 + $0x470] sm:$0xff] }
 0x151   : > { %2582 = vmatprep.subr.mxu0 %v1154_v63  ;;  %2545 = vmatpush3.msra.mxu1 %v1044_v62  ;;  %v1252_v62 = vld [vmem:[#allocation2 + $0x7f] sm:$0xff] }
 0x152   : > { %2583 = vmatpush3.msra.mxu0 %v1154_v63  ;;  %2546 = vmatprep.subr.mxu1 %v1043_v0  ;;  %v1487_v63 = vld [vmem:[#allocation3 + $0x468] sm:$0xff] }
 0x153   : > { %2584 = vmatprep.subr.mxu0 %v1153_v1  ;;  %2547 = vmatpush3.msra.mxu1 %v1043_v0  ;;  %v1486_v0 = vld [vmem:[#allocation3 + $0x460] sm:$0xff] }
 0x154   : > { %2585 = vmatpush3.msra.mxu0 %v1153_v1  ;;  %2548 = vmatprep.subr.mxu1 %v1042_v2  ;;  %v1481_v1 = vld [vmem:[#allocation3 + $0x438] sm:$0xff] }
 0x155   : > { %2586 = vmatprep.subr.mxu0 %v1152_v3  ;;  %2549 = vmatpush3.msra.mxu1 %v1042_v2  ;;  %v1479_v2 = vld [vmem:[#allocation3 + $0x428] sm:$0xff] }
 0x156   : > { %2587 = vmatpush3.msra.mxu0 %v1152_v3  ;;  %2550 = vmatprep.subr.mxu1 %v1041_v4  ;;  %v1478_v3 = vld [vmem:[#allocation3 + $0x420] sm:$0xff] }
 0x157   : > { %2588 = vmatprep.subr.mxu0 %v1151_v5  ;;  %2551 = vmatpush3.msra.mxu1 %v1041_v4  ;;  %v1477_v4 = vld [vmem:[#allocation3 + $0x418] sm:$0xff] }
 0x158   : > { %2589 = vmatpush3.msra.mxu0 %v1151_v5  ;;  %2552 = vmatprep.subr.mxu1 %v1040_v7  ;;  %v1476_v5 = vld [vmem:[#allocation3 + $0x410] sm:$0xff] }
 0x159   : > { %2590 = vmatprep.subr.mxu0 %v1150_v8  ;;  %2553 = vmatpush3.msra.mxu1 %v1040_v7  ;;  %v1475_v7 = vld [vmem:[#allocation3 + $0x408] sm:$0xff] }
 0x15a   : > { %2591 = vmatpush3.msra.mxu0 %v1150_v8  ;;  %2554 = vmatprep.subr.mxu1 %v1039_v9  ;;  %v1474_v8 = vld [vmem:[#allocation3 + $0x400] sm:$0xff] }
 0x15b   : > { %2592 = vmatprep.subr.mxu0 %v1149_v10  ;;  %2555 = vmatpush3.msra.mxu1 %v1039_v9  ;;  %v1472_v9 = vld [vmem:[#allocation2 + $0x81] sm:$0xff] }
 0x15c   : > { %2593 = vmatpush3.msra.mxu0 %v1149_v10  ;;  %2556 = vmatprep.subr.mxu1 %v1038_v12  ;;  %v1642_v10 = vld [vmem:[%s3469_s5 + $0x78] sm:$0xff] }
 0x15d   : > { %2594 = vmatprep.subr.mxu0 %v1148_v13  ;;  %2557 = vmatpush3.msra.mxu1 %v1038_v12  ;;  %v1641_v12 = vld [vmem:[%s3469_s5 + $0x70] sm:$0xff] }
 0x15e   : > { %2595 = vmatpush3.msra.mxu0 %v1148_v13  ;;  %2558 = vmatprep.subr.mxu1 %v1037_v15  ;;  %v1639_v13 = vld [vmem:[%s3469_s5 + $0x60] sm:$0xff] }
 0x15f   : > { %2596 = vmatprep.subr.mxu0 %v1147_v16  ;;  %2559 = vmatpush3.msra.mxu1 %v1037_v15  ;;  %v1638_v15 = vld [vmem:[%s3469_s5 + $0x58] sm:$0xff] }
 0x160   : > { %2597 = vmatpush3.msra.mxu0 %v1147_v16  ;;  %2560 = vmatprep.subr.mxu1 %v1036_v17  ;;  %v1637_v16 = vld [vmem:[%s3469_s5 + $0x50] sm:$0xff] }
 0x161   : > { %2598 = vmatprep.subr.mxu0 %v1146_v18  ;;  %2561 = vmatpush3.msra.mxu1 %v1036_v17  ;;  %v1636_v17 = vld [vmem:[%s3469_s5 + $0x48] sm:$0xff] }
 0x162   : > { %2599 = vmatpush3.msra.mxu0 %v1146_v18  ;;  %2562 = vmatprep.subr.mxu1 %v1035_v19  ;;  %v1635_v18 = vld [vmem:[%s3469_s5 + $0x40] sm:$0xff] }
 0x163   : > { %2600 = vmatprep.subr.mxu0 %v1145_v21  ;;  %2563 = vmatpush3.msra.mxu1 %v1035_v19  ;;  %v1634_v19 = vld [vmem:[%s3469_s5 + $0x38] sm:$0xff] }
 0x164   : > { %2601 = vmatpush3.msra.mxu0 %v1145_v21  ;;  %2564 = vmatprep.subr.mxu1 %v1034_v22  ;;  %v1633_v21 = vld [vmem:[%s3469_s5 + $0x30] sm:$0xff] }
 0x165   : > { %2602 = vmatprep.subr.mxu0 %v1144_v24  ;;  %2565 = vmatpush3.msra.mxu1 %v1034_v22  ;;  %v1632_v22 = vld [vmem:[%s3469_s5 + $0x28] sm:$0xff] }
 0x166   : > { %2603 = vmatpush3.msra.mxu0 %v1144_v24  ;;  %2567 = vmatmul.mubr.f32.vlgmr.msra.gmra.mxu1 %v3201_v6  ;;  %v1631_v24 = vld [vmem:[%s3469_s5 + $0x20] sm:$0xff] }
 0x167   : > { %2605 = vmatmul.mubr.f32.vlgmr.msra.gmra.mxu0 %v3223_v50  ;;  %2610 = vmatprep.subr.mxu1 %v1269_v25 }
 0x168   : > { %2648 = vmatprep.subr.mxu0 %v1379_v26  ;;  %2569 = vmatprep.mubr.f32.mxu1 %v3212_v14 }
 0x169   : > { %2607 = vmatprep.mubr.f32.mxu0 %v3228_v55  ;;  %2611 = vmatpush3.msra.mxu1 %v1269_v25  ;;  %v1630_v25 = vld [vmem:[%s3469_s5 + $0x18] sm:$0xff] }
 0x16a   : > { %2649 = vmatpush3.msra.mxu0 %v1379_v26  ;;  %2612 = vmatprep.subr.mxu1 %v1268_v27  ;;  %v1629_v26 = vld [vmem:[%s3469_s5 + $0x10] sm:$0xff] }
 0x16b   : > { %2650 = vmatprep.subr.mxu0 %v1378_v28  ;;  %2613 = vmatpush3.msra.mxu1 %v1268_v27  ;;  %v1628_v27 = vld [vmem:[%s3469_s5 + $0x8] sm:$0xff] }
 0x16c   : > { %2651 = vmatpush3.msra.mxu0 %v1378_v28  ;;  %2570 = vmatmul.mubr.f32.gmra.mxu1 %v3207_v11  ;;  %v1627_v28 = vld [vmem:[%s3469_s5] sm:$0xff] }
 0x16d   : > { %2608 = vmatmul.mubr.f32.gmra.mxu0 %v3240_v31  ;;  %2614 = vmatprep.subr.mxu1 %v1267_v29 }
 0x16e   : > { %2652 = vmatprep.subr.mxu0 %v1377_v30  ;;  %2615 = vmatpush3.msra.mxu1 %v1267_v29 }
 0x16f   : > { %2642 = vmatprep.mubr.f32.mxu1 %v3216_v20  ;;  %2653 = vmatpush3.msra.mxu0 %v1377_v30  ;;  %v1262_v20 = vld [vmem:[#allocation3 + $0x340] sm:$0xff] }
 0x170   : > { %2680 = vmatprep.mubr.f32.mxu0 %v3201_v6  ;;  %2616 = vmatprep.subr.mxu1 %v1266_v32  ;;  %v1372_v6 = vld [vmem:[#allocation3 + $0x3c0] sm:$0xff] }
 0x171   : > { %2654 = vmatprep.subr.mxu0 %v1376_v33  ;;  %2617 = vmatpush3.msra.mxu1 %v1266_v32 }
 0x172   : > { %2655 = vmatpush3.msra.mxu0 %v1376_v33  ;;  %2618 = vmatprep.subr.mxu1 %v1265_v34 }
 0x173   : > { %2656 = vmatprep.subr.mxu0 %v1375_v35  ;;  %2619 = vmatpush3.msra.mxu1 %v1265_v34 }
 0x174   : > { %2657 = vmatpush3.msra.mxu0 %v1375_v35  ;;  %2620 = vmatprep.subr.mxu1 %v1264_v36 }
 0x175   : > { %2658 = vmatprep.subr.mxu0 %v1374_v37  ;;  %2621 = vmatpush3.msra.mxu1 %v1264_v36 }
 0x176   : > { %2659 = vmatpush3.msra.mxu0 %v1374_v37  ;;  %2622 = vmatprep.subr.mxu1 %v1263_v38 }
 0x177   : > { %2660 = vmatprep.subr.mxu0 %v1373_v39  ;;  %2623 = vmatpush3.msra.mxu1 %v1263_v38 }
 0x178   : > { %2661 = vmatpush3.msra.mxu0 %v1373_v39  ;;  %2624 = vmatprep.subr.mxu1 %v1262_v20 }
 0x179   : > { %2662 = vmatprep.subr.mxu0 %v1372_v6  ;;  %2625 = vmatpush3.msra.mxu1 %v1262_v20 }
 0x17a   : > { %2663 = vmatpush3.msra.mxu0 %v1372_v6  ;;  %2626 = vmatprep.subr.mxu1 %v1261_v41 }
 0x17b   : > { %2664 = vmatprep.subr.mxu0 %v1371_v42  ;;  %2627 = vmatpush3.msra.mxu1 %v1261_v41 }
 0x17c   : > { %2665 = vmatpush3.msra.mxu0 %v1371_v42  ;;  %2628 = vmatprep.subr.mxu1 %v1260_v43 }
 0x17d   : > { %2666 = vmatprep.subr.mxu0 %v1370_v44  ;;  %2629 = vmatpush3.msra.mxu1 %v1260_v43 }
 0x17e   : > { %2667 = vmatpush3.msra.mxu0 %v1370_v44  ;;  %2630 = vmatprep.subr.mxu1 %v1259_v45 }
 0x17f   : > { %2668 = vmatprep.subr.mxu0 %v1369_v46  ;;  %2631 = vmatpush3.msra.mxu1 %v1259_v45 }
 0x180   : > { %2669 = vmatpush3.msra.mxu0 %v1369_v46  ;;  %2632 = vmatprep.subr.mxu1 %v1258_v47 }
 0x181   : > { %2670 = vmatprep.subr.mxu0 %v1368_v48  ;;  %2633 = vmatpush3.msra.mxu1 %v1258_v47 }
 0x182   : > { %2671 = vmatpush3.msra.mxu0 %v1368_v48  ;;  %2634 = vmatprep.subr.mxu1 %v1257_v49 }
 0x183   : > { %2672 = vmatprep.subr.mxu0 %v1367_v51  ;;  %2635 = vmatpush3.msra.mxu1 %v1257_v49 }
 0x184   : > { %2673 = vmatpush3.msra.mxu0 %v1367_v51  ;;  %2636 = vmatprep.subr.mxu1 %v1256_v52 }
 0x185   : > { %2674 = vmatprep.subr.mxu0 %v1366_v53  ;;  %2637 = vmatpush3.msra.mxu1 %v1256_v52 }
 0x186   : > { %2675 = vmatpush3.msra.mxu0 %v1366_v53  ;;  %2638 = vmatprep.subr.mxu1 %v1255_v54 }
 0x187   : > { %2676 = vmatprep.subr.mxu0 %v1365_v56  ;;  %2639 = vmatpush3.msra.mxu1 %v1255_v54 }
 0x188   : > { %2677 = vmatpush3.msra.mxu0 %v1365_v56  ;;  %2640 = vmatprep.subr.mxu1 %v1254_v58 }
 0x189   : > { %2678 = vmatprep.subr.mxu0 %v1364_v59  ;;  %2641 = vmatpush3.msra.mxu1 %v1254_v58 }
 0x18a   : > { %2679 = vmatpush3.msra.mxu0 %v1364_v59  ;;  %2643 = vmatmul.mubr.f32.vlgmr.msra.gmra.mxu1 %v3220_v23  ;;  %v1484_v23 = vld [vmem:[#allocation3 + $0x450] sm:$0xff] }
 0x18b   : > { %2681 = vmatmul.mubr.f32.vlgmr.msra.gmra.mxu0 %v3212_v14  ;;  %2686 = vmatprep.subr.mxu1 %v1489_v60  ;;  %v1485_v14 = vld [vmem:[#allocation3 + $0x458] sm:$0xff] }
 0x18c   : > { %2645 = vmatprep.mubr.f32.mxu1 %v3231_v57  ;;  %2683 = vmatprep.mubr.f32.mxu0 %v3207_v11  ;;  %v1483_v11 = vld [vmem:[#allocation3 + $0x448] sm:$0xff]  ;;  %v1482_v57 = vld [vmem:[#allocation3 + $0x440] sm:$0xff] }
 0x18d   : > { %2687 = vmatpush3.msra.mxu1 %v1489_v60  ;;  %2724 = vmatprep.subr.mxu0 %v3005_v40 }
 0x18e   : > { %2688 = vmatprep.subr.mxu1 %v1488_v61  ;;  %2646 = vmatmul.mubr.f32.gmra.mxu1 %v1252_v62 }
 0x18f   : > { %2689 = vmatpush3.msra.mxu1 %v1488_v61  ;;  %2718 = vmatprep.mubr.f32.mxu1 %v3223_v50  ;;  %v1480_v50 = vld [vmem:[#allocation3 + $0x430] sm:$0xff] }
 0x190   : > { %2690 = vmatprep.subr.mxu1 %v1487_v63  ;;  %2684 = vmatmul.mubr.f32.gmra.mxu0 %v3005_v40 }
 0x191   : > { %2691 = vmatpush3.msra.mxu1 %v1487_v63  ;;  %2725 = vmatpush3.msra.mxu0 %v1642_v10 }
 0x192   : > { %2692 = vmatprep.subr.mxu1 %v1486_v0  ;;  %2726 = vmatprep.subr.mxu0 %v3005_v40 }
 0x193   : > { %2693 = vmatpush3.msra.mxu1 %v1486_v0  ;;  %2727 = vmatpush3.msra.mxu0 %v1641_v12 }
 0x194   : > { %2694 = vmatprep.subr.mxu1 %v1485_v14  ;;  %2728 = vmatprep.subr.mxu0 %v3005_v40 }
 0x195   : > { %2695 = vmatpush3.msra.mxu1 %v1485_v14  ;;  %2756 = vmatprep.mubr.msk.f32.mxu0 %vm3006_vm1, %v3005_v40 }
 0x196   : > { %2696 = vmatprep.subr.mxu1 %v1484_v23 }
 0x197   : > { %2697 = vmatpush3.msra.mxu1 %v1484_v23 }
 0x198   : > { %2698 = vmatprep.subr.mxu1 %v1483_v11 }
 0x199   : > { %2699 = vmatpush3.msra.mxu1 %v1483_v11 }
 0x19a   : > { %2700 = vmatprep.subr.mxu1 %v1482_v57 }
 0x19b   : > { %2701 = vmatpush3.msra.mxu1 %v1482_v57 }
 0x19c   : > { %2702 = vmatprep.subr.mxu1 %v1481_v1 }
 0x19d   : > { %2703 = vmatpush3.msra.mxu1 %v1481_v1 }
 0x19e   : > { %2704 = vmatprep.subr.mxu1 %v1480_v50 }
 0x19f   : > { %2705 = vmatpush3.msra.mxu1 %v1480_v50 }
 0x1a0   : > { %2706 = vmatprep.subr.mxu1 %v1479_v2 }
 0x1a1   : > { %2707 = vmatpush3.msra.mxu1 %v1479_v2 }
 0x1a2   : > { %2708 = vmatprep.subr.mxu1 %v1478_v3 }
 0x1a3   : > { %2709 = vmatpush3.msra.mxu1 %v1478_v3 }
 0x1a4   : > { %2710 = vmatprep.subr.mxu1 %v1477_v4 }
 0x1a5   : > { %2711 = vmatpush3.msra.mxu1 %v1477_v4 }
 0x1a6   : > { %2712 = vmatprep.subr.mxu1 %v1476_v5 }
 0x1a7   : > { %2713 = vmatpush3.msra.mxu1 %v1476_v5 }
 0x1a8   : > { %2714 = vmatprep.subr.mxu1 %v1475_v7 }
 0x1a9   : > { %2715 = vmatpush3.msra.mxu1 %v1475_v7 }
 0x1aa   : > { %2716 = vmatprep.subr.mxu1 %v1474_v8 }
 0x1ab   : > { %2717 = vmatpush3.msra.mxu1 %v1474_v8 }
 0x1ac   : > { %2719 = vmatmul.mubr.f32.vlgmr.msra.gmra.mxu1 %v3228_v55  ;;  %v1640_v55 = vld [vmem:[%s3469_s5 + $0x68] sm:$0xff] }
 0x1ad   : > { %2721 = vmatprep.mubr.f32.mxu1 %v3240_v31  ;;  %2729 = vmatpush3.msra.mxu0 %v1640_v55 }
 0x1ae   : > { %2730 = vmatprep.subr.mxu0 %v3005_v40 }
 0x1af   : > { %2731 = vmatpush3.msra.mxu0 %v1639_v13 }
 0x1b0   : > { %2722 = vmatmul.mubr.f32.gmra.mxu1 %v1472_v9  ;;  %2732 = vmatprep.subr.mxu0 %v3005_v40 }
 0x1b1   : > { %2733 = vmatpush3.msra.mxu0 %v1638_v15 }
 0x1b2   : > { %2734 = vmatprep.subr.mxu0 %v3005_v40 }
 0x1b3   : > { %2735 = vmatpush3.msra.mxu0 %v1637_v16 }
 0x1b4   : > { %2736 = vmatprep.subr.mxu0 %v3005_v40 }
 0x1b5   : > { %2737 = vmatpush3.msra.mxu0 %v1636_v17  ;;  %v2109_v17 = vld [vmem:[%s3468_s4] ss:$0 sm:$0xff] }
 0x1b6   : > { %2738 = vmatprep.subr.mxu0 %v3005_v40 }
 0x1b7   : > { %2739 = vmatpush3.msra.mxu0 %v1635_v18 }
 0x1b8   : > { %2740 = vmatprep.subr.mxu0 %v3005_v40 }
 0x1b9   : > { %2741 = vmatpush3.msra.mxu0 %v1634_v19 }
 0x1ba   : > { %2742 = vmatprep.subr.mxu0 %v3005_v40 }
 0x1bb   : > { %2743 = vmatpush3.msra.mxu0 %v1633_v21 }
 0x1bc   : > { %2744 = vmatprep.subr.mxu0 %v3005_v40 }
 0x1bd   : > { %2745 = vmatpush3.msra.mxu0 %v1632_v22 }
 0x1be   : > { %2746 = vmatprep.subr.mxu0 %v3005_v40 }
 0x1bf   : > { %2747 = vmatpush3.msra.mxu0 %v1631_v24 }
 0x1c0   : > { %2748 = vmatprep.subr.mxu0 %v3005_v40 }
 0x1c1   : > { %2749 = vmatpush3.msra.mxu0 %v1630_v25 }
 0x1c2   : > { %2750 = vmatprep.subr.mxu0 %v3005_v40 }
 0x1c3   : > { %2751 = vmatpush3.msra.mxu0 %v1629_v26 }
 0x1c4   : > { %2752 = vmatprep.subr.mxu0 %v3005_v40 }
 0x1c5   : > { %2753 = vmatpush3.msra.mxu0 %v1628_v27 }
 0x1c6   : > { %2754 = vmatprep.subr.mxu0 %v3005_v40 }
 0x1c7   : > { %2755 = vmatpush3.msra.mxu0 %v1627_v28 }
 0x1c8   : > { %2759 = vmatprep.subr.mxu0 %v3005_v40 }
 0x1dd   : > { %v2416_v29 = vpop.f32.mrf.mxu1 }
 0x1df   : > { %v705_v31 = vpop.f32.mrf.mxu1 }
 0x1e1   : > { %v2419_v33 = vpop.f32.mrf.mxu1 }
 0x1e3   : > { %v715_v35 = vpop.f32.mrf.mxu1 }
 0x1e5   : > { %v2454_v30 = vpop.f32.mrf.mxu0 }
 0x1e6   : > { %v796_v52 = vadd.f32 %v2454_v30, %v2416_v29 }
 0x1e7   : > { %v790_v32 = vpop.f32.mrf.mxu0 }
 0x1e8   : > { %v791_v54 = vadd.f32 %v790_v32, %v705_v31 }
 0x1e9   : > { %v2457_v34 = vpop.f32.mrf.mxu0 }
 0x1ea   : > { %v806_v60 = vadd.f32 %v2457_v34, %v2419_v33 }
 0x1eb   : > { %v800_v37 = vpop.f32.mrf.mxu0 }
 0x1ec   : > { %v801_v63 = vadd.f32 %v800_v37, %v715_v35 }
 0x200   : > { %v2492_v36 = vpop.f32.mrf.mxu1 }
 0x201   : > { %v916_v56 = vadd.f32 %v2492_v36, %v796_v52 }
 0x202   : > { %v896_v39 = vpop.f32.mrf.mxu1 }
 0x203   : > { %v915_v62 = vadd.f32 %v896_v39, %v791_v54 }
 0x205   : > { %v2530_v38 = vpop.f32.mrf.mxu0 }
 0x206   : > { %v1026_v61 = vadd.f32 %v2530_v38, %v916_v56 }
 0x207   : > { %v1006_v20 = vpop.f32.mrf.mxu0 }
 0x208   : > { %v2495_v6 = vpop.f32.mrf.mxu1  ;;  %v1025_v0 = vadd.f32 %v1006_v20, %v915_v62 }
 0x209   : > { %v2533_v41 = vpop.f32.mrf.mxu0  ;;  %v918_v14 = vadd.f32 %v2495_v6, %v806_v60 }
 0x20a   : > { %v906_v42 = vpop.f32.mrf.mxu1 }
 0x20b   : > { %v1016_v44 = vpop.f32.mrf.mxu0  ;;  %v1028_v1 = vadd.f32 %v2533_v41, %v918_v14  ;;  %v917_v50 = vadd.f32 %v906_v42, %v801_v63 }
 0x20d   : > { %v1027_v4 = vadd.f32 %v1016_v44, %v917_v50  ;;  %v1643_v50 = vld [vmem:[%s3470_s6] sm:$0x1] }
 0x226   : > { %v2568_v43 = vpop.f32.mrf.mxu1 }
 0x227   : > { %v2606_v45 = vpop.f32.mrf.mxu0  ;;  %v1136_v23 = vadd.f32 %v2568_v43, %v1026_v61 }
 0x228   : > { %v1116_v46 = vpop.f32.mrf.mxu1 }
 0x229   : > { %v1226_v40 = vpop.f32.mrf.mxu0  ;;  %v1246_v2 = vadd.f32 %v2606_v45, %v1136_v23  ;;  %v1135_v3 = vadd.f32 %v1116_v46, %v1025_v0 }
 0x22b   : > { %v1245_v5 = vadd.f32 %v1226_v40, %v1135_v3 }
 0x22c   : > { %v2571_v47 = vpop.f32.mrf.mxu1 }
 0x22d   : > { %v2609_v48 = vpop.f32.mrf.mxu0  ;;  %v1138_v7 = vadd.f32 %v2571_v47, %v1028_v1  ;;  %v1721_v1 = vld [vmem:[%s3471_s7] sm:$0xff] }
 0x22e   : > { %v1126_v49 = vpop.f32.mrf.mxu1 }
 0x22f   : > { %v1236_v53 = vpop.f32.mrf.mxu0  ;;  %v1248_v12 = vadd.f32 %v2609_v48, %v1138_v7  ;;  %v1137_v55 = vadd.f32 %v1126_v49, %v1027_v4 }
 0x231   : > { %v1247_v18 = vadd.f32 %v1236_v53, %v1137_v55  ;;  %v1803_v55 = vld [vmem:[%s3473_s9] sm:$0xff] }
 0x24a   : > { %v2644_v51 = vpop.f32.mrf.mxu1 }
 0x24b   : > { %v2682_v58 = vpop.f32.mrf.mxu0  ;;  %v1356_v8 = vadd.f32 %v2644_v51, %v1246_v2 }
 0x24c   : > { %v1336_v59 = vpop.f32.mrf.mxu1 }
 0x24d   : > { %v1446_v11 = vpop.f32.mrf.mxu0  ;;  %v1466_v13 = vadd.f32 %v2682_v58, %v1356_v8  ;;  %v1355_v15 = vadd.f32 %v1336_v59, %v1245_v5 }
 0x24e   : > { %v2647_v57 = vpop.f32.mrf.mxu1 }
 0x24f   : > { %v1465_v19 = vadd.f32 %v1446_v11, %v1355_v15  ;;  %v1358_v21 = vadd.f32 %v2647_v57, %v1248_v12  ;;  %v2905_v57 = vld [vmem:[#allocation2] sm:$0xff]  ;;  %v1804_v12 = vld [vmem:[%s3473_s9 + $0x8] sm:$0xff]  ;;  %v1901_v15 = vld [vmem:[%s3474_s10 + $0x70] sm:$0xff] }
 0x250   : > { %v1346_v9 = vpop.f32.mrf.mxu1  ;;  %v2685_v10 = vpop.f32.mrf.mxu0 }
 0x251   : > { %v1357_v26 = vadd.f32 %v1346_v9, %v1247_v18  ;;  %v1468_v27 = vadd.f32 %v2685_v10, %v1358_v21  ;;  %v1898_v18 = vld [vmem:[%s3474_s10 + $0x58] sm:$0xff]  ;;  %v1896_v21 = vld [vmem:[%s3474_s10 + $0x48] sm:$0xff] }
 0x252   : > { %v1456_v24 = vpop.f32.mrf.mxu0 }
 0x253   : > { %v1467_v31 = vadd.f32 %v1456_v24, %v1357_v26  ;;  %v1894_v24 = vld [vmem:[%s3474_s10 + $0x38] sm:$0xff]  ;;  %v1892_v26 = vld [vmem:[%s3474_s10 + $0x28] sm:$0xff] }
 0x26c   : > { %v2720_v16 = vpop.f32.mrf.mxu1 }
 0x26d   : > { %v1576_v22 = vadd.f32 %v2720_v16, %v1466_v13  ;;  %v1902_v13 = vld [vmem:[%s3474_s10 + $0x78] sm:$0xff]  ;;  %v1900_v16 = vld [vmem:[%s3474_s10 + $0x68] sm:$0xff] }
 0x26e   : > { %v1556_v25 = vpop.f32.mrf.mxu1  ;;  %2771 = vmatprep.subr.mxu1 %v1902_v13 }
 0x26f   : > { %v1587_v28 = vadd.f32 %v2109_v17, %v1576_v22  ;;  %v1575_v29 = vadd.f32 %v1556_v25, %v1465_v19  ;;  %2772 = vmatpush3.msra.mxu1 %v1902_v13  ;;  %v1897_v19 = vld [vmem:[%s3474_s10 + $0x50] sm:$0xff]  ;;  %v1895_v22 = vld [vmem:[%s3474_s10 + $0x40] sm:$0xff] }
 0x270   : > { %v2723_v30 = vpop.f32.mrf.mxu1  ;;  %2773 = vmatprep.subr.mxu1 %v1901_v15  ;;  %v1893_v25 = vld [vmem:[%s3474_s10 + $0x30] sm:$0xff] }
 0x271   : > { %v2111_v32 = vmul.f32 -1.442695, %v1587_v28  ;;  %v1586_v33 = vadd.f32 %v2109_v17, %v1575_v29  ;;  %v1578_v34 = vadd.f32 %v2723_v30, %v1468_v27  ;;  %2774 = vmatpush3.msra.mxu1 %v1901_v15  ;;  %v1891_v27 = vld [vmem:[%s3474_s10 + $0x20] sm:$0xff] }
 0x272   : > { %v1566_v35 = vpop.f32.mrf.mxu1  ;;  %2775 = vmatprep.subr.mxu1 %v1900_v16  ;;  %v1722_v29 = vld [vmem:[%s3472_s8] sm:$0x1] }
 0x273   : > { %2881 = vpow2.f32 %v2111_v32  ;;  %v2110_v36 = vmul.f32 -1.442695, %v1586_v33  ;;  %v1589_v37 = vadd.f32 %v2109_v17, %v1578_v34  ;;  %v1577_v38 = vadd.f32 %v1566_v35, %v1467_v31  ;;  %2776 = vmatpush3.msra.mxu1 %v1900_v16 }
 0x275   : > { %2883 = vpow2.f32 %v2110_v36  ;;  %v2113_v39 = vmul.f32 -1.442695, %v1589_v37  ;;  %v1588_v20 = vadd.f32 %v2109_v17, %v1577_v38  ;;  %v1899_v17 = vld [vmem:[%s3474_s10 + $0x60] sm:$0xff]  ;;  %v1888_v38 = vld [vmem:[%s3474_s10 + $0x8] sm:$0xff] }
 0x276   : > { %2777 = vmatprep.subr.mxu1 %v1899_v17 }
 0x277   : > { %2885 = vpow2.f32 %v2113_v39  ;;  %v2112_v6 = vmul.f32 -1.442695, %v1588_v20  ;;  %2778 = vmatpush3.msra.mxu1 %v1899_v17  ;;  %v1887_v39 = vld [vmem:[%s3474_s10] sm:$0xff] }
 0x278   : > { %2779 = vmatprep.subr.mxu1 %v1898_v18 }
 0x279   : > { %2887 = vpow2.f32 %v2112_v6  ;;  %2780 = vmatpush3.msra.mxu1 %v1898_v18 }
 0x27a   : > { %2781 = vmatprep.subr.mxu1 %v1897_v19 }
 0x27b   : > { %2782 = vmatpush3.msra.mxu1 %v1897_v19 }
 0x27c   : > { %2783 = vmatprep.subr.mxu1 %v1896_v21 }
 0x27d   : > { %2784 = vmatpush3.msra.mxu1 %v1896_v21 }
 0x27e   : > { %2785 = vmatprep.subr.mxu1 %v1895_v22 }
 0x27f   : > { %2786 = vmatpush3.msra.mxu1 %v1895_v22 }
 0x280   : > { %v2882_v41 = vpop.eup %2881  ;;  %2787 = vmatprep.subr.mxu1 %v1894_v24 }
 0x281   : > { %v1603_v42 = vadd.f32 1.0, %v2882_v41  ;;  %2788 = vmatpush3.msra.mxu1 %v1894_v24 }
 0x282   : > { %v2884_v43 = vpop.eup %2883  ;;  %2789 = vmatprep.subr.mxu1 %v1893_v25 }
 0x283   : > { %v1602_v44 = vadd.f32 1.0, %v2884_v43  ;;  %2889 = vrcp.f32 %v1603_v42  ;;  %2790 = vmatpush3.msra.mxu1 %v1893_v25 }
 0x284   : > { %v2886_v45 = vpop.eup %2885  ;;  %2791 = vmatprep.subr.mxu1 %v1892_v26 }
 0x285   : > { %2891 = vrcp.f32 %v1602_v44  ;;  %v1605_v46 = vadd.f32 1.0, %v2886_v45  ;;  %2792 = vmatpush3.msra.mxu1 %v1892_v26 }
 0x286   : > { %v2888_v40 = vpop.eup %2887  ;;  %2793 = vmatprep.subr.mxu1 %v1891_v27 }
 0x287   : > { %v1604_v47 = vadd.f32 1.0, %v2888_v40  ;;  %2893 = vrcp.f32 %v1605_v46  ;;  %2794 = vmatpush3.msra.mxu1 %v1891_v27 }
 0x289   : > { %2895 = vrcp.f32 %v1604_v47 }
 0x290   : > { %v2890_v48 = vpop.eup %2889 }
 0x291   : > { %v3325_v53 = vmul.f32 %v2890_v48, %v1587_v28  ;;  %v1890_v28 = vld [vmem:[%s3474_s10 + $0x18] sm:$0xff]  ;;  %v2118_v48 = vld [vmem:[%s3475_s11] ss:$0 sm:$0xff] }
 0x292   : > { %v2892_v49 = vpop.eup %2891  ;;  %2795 = vmatprep.subr.mxu1 %v1890_v28 }
 0x293   : > { %v3323_v51 = vmul.f32 %v2892_v49, %v1586_v33  ;;  %2796 = vmatpush3.msra.mxu1 %v1890_v28 }
 0x294   : > { %v2894_v52 = vpop.eup %2893 }
 0x295   : > { %v1618_v56 = vadd.f32 %v3325_v53, %v3323_v51  ;;  %v3331_v59 = vmul.f32 %v2894_v52, %v1589_v37  ;;  %v1889_v37 = vld [vmem:[%s3474_s10 + $0x10] sm:$0xff] }
 0x296   : > { %v2896_v54 = vpop.eup %2895  ;;  %2797 = vmatprep.subr.mxu1 %v1889_v37 }
 0x297   : > { %v3329_v58 = vmul.f32 %v2896_v54, %v1588_v20  ;;  %2798 = vmatpush3.msra.mxu1 %v1889_v37  ;;  %v1879_v20 = vlaneseq }
 0x298   : > { %2799 = vmatprep.subr.mxu1 %v1888_v38 }
 0x299   : > { %v1619_v60 = vadd.f32 %v1618_v56, %v3329_v58  ;;  %2800 = vmatpush3.msra.mxu1 %v1888_v38  ;;  %v1880_v6 = vshrl.u32 %v1879_v20, 7 }
 0x29a   : > { %2801 = vmatprep.subr.mxu1 %v1887_v39 }
 0x29b   : > { %v1620_v61 = vadd.f32 %v1619_v60, %v3331_v59  ;;  %2802 = vmatpush3.msra.mxu1 %v1887_v39  ;;  %v1881_v41 = vsub.s32 0, %v1880_v6 }
 0x29d   : > { %v1621_v62 = vrot.slane %v1620_v61, 4 }
 0x29f   : > { %v1622_v63 = vadd.f32 %v1621_v62, %v1620_v61 }
 0x2a1   : > { %v1623_v0 = vrot.slane %v1622_v63, 2 }
 0x2a3   : > { %v1624_v14 = vadd.f32 %v1623_v0, %v1622_v63  ;;  %v2908_v63 = vld [vmem:[%s3146_s23 + $0x18] sm:$0xff] }
 0x2a5   : > { %v1625_v23 = vrot.slane %v1624_v14, 1 }
 0x2a7   : > { %v1626_v11 = vadd.f32 %v1625_v23, %v1624_v14  ;;  %v2909_v23 = vld [vmem:[%s3146_s23 + $0x10] sm:$0xff] }
 0x2a9   : > { %2757 = vmatmul.mubr.f32.vlgmr.msra.gmra.mxu0 %v1626_v11 }
 0x2aa   : > { %2761 = vmatprep.mubr.msk.f32.mxu0 %vm3006_vm1, %v2905_v57  ;;  %2760 = vmatpush3.msra.mxu0 %v1721_v1 }
 0x2ab   : > { %2764 = vmatprep.subr.mxu0 %v2905_v57 }
 0x369   : > { %v1710_v2 = vpop.f32.mrf.mxu0 }
 0x36a   : > { %v1711_v3 = vadd.f32 %v1710_v2, %v1643_v50 }
 0x36b   : > { %v2758_v4 = vpop.f32.mrf.mxu0 }
 0x36c   : > { %v2114_v5 = vmul.f32 -1.442695, %v1711_v3 }
 0x36e   : > { %2897 = vpow2.f32 %v2114_v5 }
 0x37b   : > { %v2898_v7 = vpop.eup %2897 }
 0x37c   : > { %v1717_v8 = vadd.f32 1.0, %v2898_v7 }
 0x37e   : > { %2899 = vrcp.f32 %v1717_v8 }
 0x38b   : > { %v2900_v9 = vpop.eup %2899 }
 0x38c   : > { %v1720_v10 = vmul.f32 %v2900_v9, %v1711_v3 }
 0x38e   : > { %2762 = vmatmul.mubr.msk.f32.vlgmr.msra.gmra.mxu0 %vm1723_vm2, %v1720_v10 }
 0x38f   : > { %2768 = vmatprep.mubr.msk.f32.mxu0 %vm3006_vm1, %v2905_v57  ;;  %2765 = vmatpush3.msra.mxu0 %v1804_v12 }
 0x390   : > { %2766 = vmatprep.subr.mxu0 %v2905_v57 }
 0x391   : > { %2767 = vmatpush3.msra.mxu0 %v1803_v55 }
 0x44e   : > { %v1793_v30 = vpop.f32.mrf.mxu0 }
 0x44f   : > { %v1794_v31 = vadd.f32 %v1793_v30, %v1722_v29 }
 0x450   : > { %v2763_v32 = vpop.f32.mrf.mxu0 }
 0x451   : > { %v2116_v33 = vmul.f32 -1.442695, %v1794_v31 }
 0x453   : > { %2901 = vpow2.f32 %v2116_v33 }
 0x460   : > { %v2902_v34 = vpop.eup %2901 }
 0x461   : > { %v1800_v35 = vadd.f32 1.0, %v2902_v34 }
 0x463   : > { %2903 = vrcp.f32 %v1800_v35 }
 0x470   : > { %v2904_v36 = vpop.eup %2903 }
 0x471   : > { %2769 = vmatmul.mubr.msk.f32.vlgmr.msra.gmra.mxu0 %vm1805_vm3, %v2904_v36 }
 0x531   : > { %v1875_v42 = vpop.f32.mrf.mxu0 }
 0x532   : > { %v1882_v43 = vrot.slane %v1875_v42, %v1881_v41 }
 0x533   : > { %v2770_v44 = vpop.f32.mrf.mxu0 }
 0x534   : > { %v1884_v45 = vmul.f32 %v1882_v43, %v3325_v53  ;;  %v1883_v46 = vmul.f32 %v1882_v43, %v3323_v51  ;;  %v1885_v40 = vmul.f32 %v1882_v43, %v3329_v58  ;;  %v1886_v47 = vmul.f32 %v1882_v43, %v3331_v59  ;;  %v2906_v53 = vld [vmem:[%s3146_s23 + $0x8] sm:$0xff]  ;;  %v2907_v59 = vld [vmem:[%s3146_s23] sm:$0xff] }
 0x536   : > { %2803 = vmatprep.mubr.f32.mxu1 %v1883_v46 }
 0x537   : > { %2804 = vmatmul.mubr.f32.vlgmr.msra.gmra.mxu1 %v1884_v45 }
 0x538   : > { %2806 = vmatprep.mubr.f32.mxu1 %v1885_v40 }
 0x53b   : > { %2807 = vmatmul.mubr.f32.gmra.mxu1 %v1886_v47 }
 0x5f7   : > { %v2805_v49 = vpop.f32.mrf.mxu1 }
 0x5f8   : > { %v1982_v52 = vadd.f32 %v2805_v49, %v2118_v48 }
 0x5f9   : > { %v1976_v51 = vpop.f32.mrf.mxu1 }
 0x5fa   : > { %v1996_v54 = vadd.f32 %v2906_v53, %v1982_v52  ;;  %v1977_v56 = vadd.f32 %v2118_v48, %v1976_v51 }
 0x5fb   : > { %v2808_v58 = vpop.f32.mrf.mxu1 }
 0x5fc   : > { %2000 = vst.msk [vmem:[%s421_s16 + $0x8] sm:$0xff] %vm446_vm0, %v1996_v54  ;;  %v1995_v60 = vadd.f32 %v2907_v59, %v1977_v56  ;;  %v1992_v61 = vadd.f32 %v2808_v58, %v2118_v48 }
 0x5fd   : > { %v1986_v62 = vpop.f32.mrf.mxu1 }
 0x5fe   : > { %1999 = vst.msk [vmem:[%s421_s16] sm:$0xff] %vm446_vm0, %v1995_v60  ;;  %v1998_v0 = vadd.f32 %v2908_v63, %v1992_v61  ;;  %v1987_v14 = vadd.f32 %v2118_v48, %v1986_v62 }
 0x600   : > { %2002 = vst.msk [vmem:[%s421_s16 + $0x18] sm:$0xff] %vm446_vm0, %v1998_v0  ;;  %v1997_v11 = vadd.f32 %v2909_v23, %v1987_v14 }
 0x602   : > { %2001 = vst.msk [vmem:[%s421_s16 + $0x10] sm:$0xff] %vm446_vm0, %v1997_v11 }
 0x603   : > { %2949 = shalt.err (!%p2946_p0)
}
 0x604   : > { %s2950_s23 = scalar_lea.hbm %s3419_s20, 512  ;;  %s2954_s17 = scalar_lea.hbm %s3476_s12, 1024 }
 0x605   : > { %p2951_p1 = scmp.ne.s32.totalorder %s3419_s20, %s2950_s23  ;;  %p2955_p4 = scmp.lt.s32.totalorder %s3419_s20, %s3476_s12 }
 0x606   : > { %p2956_p7 = scmp.lt.s32.totalorder %s2954_s17, %s2950_s23 }
 0x607   : > { %p2952_p2 = pnand %p2951_p1, %p3113_p5 }
 0x608   : > { %p2957_p8 = por %p2956_p7, %p2955_p4 }
 0x609   : > { %p2953_p3 = pneg %p2952_p2 }
 0x60b   : > { %p2958_p6 = pnand %p2957_p8, %p2953_p3 }
 0x60d   : > { %2961 = shalt.err (!%p2958_p6)
}
 0x60e   : > { %s3008_s28 = smov 128   ;;  %s3009_s29 = smov 8  }
 0x60f   : > { %2813 = dma.vmem_to_hbm [thread:$0]  (%p3113_p5), %s3414_s18, 512, %s3419_s20, %s3424_s25, %s3008_s28, %s3008_s28, %s3009_s29  }
 0x610 PF: > { %p2825_p9 = scmp.ge.s32.totalorder %s3000_s24, 2  ;;  %s2032_s19 = sand.u32 1, %s2988_s21  }
 0x611   : > { %p3483_p10 = scmp.ne.s32.totalorder %s3481_s14, 0  ;;  %s2033_s23 = scalar_lea.sflag [#allocation5], %s2032_s19 }
 0x613   : > { %p2820_p11 = pnand %p2825_p9, %p3483_p10 }
 0x615   : > { %p2821_p12 = pneg %p2820_p11 }
 0x617   : > { %2983 = dma.done.wait (%p2821_p12), %s2033_s23, 512  }
 0x618   : > { %2985 = vsyncadd (%p2821_p12), %s2033_s23, 4294966784  ;;  %s3484_s26 = sld [smem:[#allocation9_spill]]  ;;  %p23_p13 = scmp.ge.s32.totalorder %s3100_s27, 4  }
 0x619   : > { %s3485_s23 = sld [smem:[#allocation10_spill]]  ;;  %s3486_s21 = smov %s2992_s22 }
 0x61a   : > { %s3488_s24 = smov %s3100_s27  ;;  %25 = sbr.rel (!%p23_p13) target bundleno = 4 (0x4), region = 120 }
 0x61e   : > { %s3487_s22 = smov %s3484_s26 }
 0x61f   :  { %2038 = vsyncpa [#allocation4], 1 }
 0x620   :  { %2040 = vsyncpa [#allocation4 + $0x1], 1 }
 0x621   :  { %2041 = vsyncpa [#allocation5], 1 }
 0x622   :  { %2043 = vsyncpa [#allocation5 + $0x1], 1 }

</bundles_post_ra>
